<compile_context>
chip_gen: v5e
topology: v5e:2x2
jax: 0.10.0
libtpu: 0.0.40
codegen_flags: <defaults>
</compile_context>

<pallas_src>
import functools

import jax
import jax.numpy as jnp
from jax.experimental import pallas as pl
from jax.experimental.pallas import tpu as pltpu


# ----------------------------------------------------------------------------
# GRU layer kernel: single invocation, fori_loop over time, VMEM-resident.
# ----------------------------------------------------------------------------
def _gru_layer_kernel(gxr_ref, gxz_ref, gxn_ref,
                      whr_ref, whz_ref, whn_ref,
                      bhn_ref, h0_ref, out_ref, hT_ref):
    """One GRU layer over the whole sequence.

    gxr_ref/gxz_ref/gxn_ref : (T, B, H)  precomputed input-side gate terms
                              (r/z already include b_ih + b_hh, n includes b_ih)
    whr_ref/whz_ref/whn_ref : (H, H)     hidden weights per gate, transposed
    bhn_ref                 : (1, H)     hidden bias of the n gate
    h0_ref                  : (B, H)     initial hidden state
    out_ref                 : (T, B, H)  per-timestep hidden outputs
    hT_ref                  : (B, H)     final hidden state (written once)
    """
    T = gxr_ref.shape[0]

    whr = whr_ref[...]
    whz = whz_ref[...]
    whn = whn_ref[...]
    bhn = bhn_ref[...]

    def body(t, h_prev):
        gxr = gxr_ref[t]                                  # (B, H)
        gxz = gxz_ref[t]
        gxn = gxn_ref[t]

        ghr = jnp.dot(h_prev, whr, preferred_element_type=jnp.float32)
        ghz = jnp.dot(h_prev, whz, preferred_element_type=jnp.float32)
        ghn = jnp.dot(h_prev, whn, preferred_element_type=jnp.float32) + bhn

        r = jax.nn.sigmoid(gxr + ghr)
        z = jax.nn.sigmoid(gxz + ghz)
        n = jnp.tanh(gxn + r * ghn)

        h_new = (1.0 - z) * n + z * h_prev                # (B, H)
        out_ref[t] = h_new.astype(out_ref.dtype)
        return h_new

    hT = jax.lax.fori_loop(0, T, body, h0_ref[...].astype(jnp.float32),
                           unroll=True)
    hT_ref[...] = hT.astype(hT_ref.dtype)                 # written exactly once


def gru_layer(x, h0, w_ih, w_hh, b_ih, b_hh):
    """Run one GRU layer over the full sequence.

    x    : (T, B, D)
    h0   : (B, H)
    w_ih : (3H, D)   PyTorch layout (gate order r, z, n)
    w_hh : (3H, H)
    b_ih : (3H,)
    b_hh : (3H,)
    returns (out (T, B, H), h_T (B, H))
    """
    T, B, D = x.shape
    H = w_hh.shape[1]

    f32 = jnp.float32
    x2d = x.reshape(T * B, D).astype(f32)

    # Hoisted input projection: one big (T*B, D) @ (D, 3H) matmul (XLA),
    # with r/z hidden biases folded in so the recurrence body only adds b_hn.
    gx = jnp.dot(x2d, jnp.transpose(w_ih).astype(f32),
                 preferred_element_type=f32) + b_ih.astype(f32)   # (T*B, 3H)
    gxr = (gx[:, 0:H] + b_hh[0:H].astype(f32)).reshape(T, B, H)
    gxz = (gx[:, H:2 * H] + b_hh[H:2 * H].astype(f32)).reshape(T, B, H)
    gxn = gx[:, 2 * H:3 * H].reshape(T, B, H)

    # Per-gate hidden weights, transposed — lane-aligned blocks, no in-kernel
    # gate slicing.
    whr = jnp.transpose(w_hh[0:H]).astype(f32)            # (H, H)
    whz = jnp.transpose(w_hh[H:2 * H]).astype(f32)        # (H, H)
    whn = jnp.transpose(w_hh[2 * H:3 * H]).astype(f32)    # (H, H)
    bhn = b_hh[2 * H:3 * H].reshape(1, H).astype(f32)

    out, hT = pl.pallas_call(
        _gru_layer_kernel,
        out_shape=(
            jax.ShapeDtypeStruct((T, B, H), f32),
            jax.ShapeDtypeStruct((B, H), f32),
        ),
    )(gxr, gxz, gxn, whr, whz, whn, bhn, h0.astype(f32))
    return out, hT


# ----------------------------------------------------------------------------
# Contrastive loss kernel: grid over the N contrastive pairs, h passed once,
# scalar accumulator resident across the grid.
# ----------------------------------------------------------------------------
def _loss_kernel(h_ref, pos_ref, neg_ref, out_ref, *, batch_size):
    """Accumulate -(sum(logsigmoid(score) - logsigmoid(neg_score))) / batch.

    h_ref   : (L, B, H)     final hidden state (same block for every n)
    pos_ref : (1, L, B, H)  positive sample for pair n
    neg_ref : (1, L, B, H)  negative sample for pair n
    out_ref : (1, 1)        scalar accumulator (resident across grid)
    """
    n = pl.program_id(0)

    @pl.when(n == 0)
    def _():
        out_ref[...] = jnp.zeros_like(out_ref)

    h = h_ref[...]                                   # (L, B, H)
    pos = pos_ref[0]                                 # (L, B, H)
    neg = neg_ref[0]                                 # (L, B, H)

    score = jnp.sum(h * pos, axis=1)                 # (L, H) -- torch sum(dim=1)
    neg_score = jnp.sum(h * neg, axis=1)             # (L, H)

    pair = jnp.sum(jax.nn.log_sigmoid(score) - jax.nn.log_sigmoid(neg_score))
    out_ref[...] += (-pair / jnp.float32(batch_size)).reshape(1, 1)


def contrastive_loss_total(h, pos, neg, batch_size):
    """h: (L, B, H); pos/neg: (N, L, B, H). Returns scalar (sum over N pairs)."""
    N, L, B, H = pos.shape
    loss = pl.pallas_call(
        functools.partial(_loss_kernel, batch_size=batch_size),
        out_shape=jax.ShapeDtypeStruct((1, 1), jnp.float32),
        grid_spec=pltpu.PrefetchScalarGridSpec(
            num_scalar_prefetch=0,
            grid=(N,),
            in_specs=[
                pl.BlockSpec((L, B, H), lambda n: (0, 0, 0)),
                pl.BlockSpec((1, L, B, H), lambda n: (n, 0, 0, 0)),
                pl.BlockSpec((1, L, B, H), lambda n: (n, 0, 0, 0)),
            ],
            out_specs=pl.BlockSpec((1, 1), lambda n: (0, 0)),
        ),
        compiler_params=pltpu.CompilerParams(
            dimension_semantics=("arbitrary",)),
    )(h.astype(jnp.float32), pos.astype(jnp.float32), neg.astype(jnp.float32))
    return loss[0, 0]


# ----------------------------------------------------------------------------
# GRUCPC forward
# ----------------------------------------------------------------------------
def init_gru_params(key, in_dim, hid_dim, nlayers):
    """Deterministic PyTorch-style init: uniform(-1/sqrt(H), 1/sqrt(H))."""
    k = 1.0 / jnp.sqrt(jnp.float32(hid_dim))
    params = []
    for layer in range(nlayers):
        d_in = in_dim if layer == 0 else hid_dim
        key, k1, k2, k3, k4 = jax.random.split(key, 5)
        w_ih = jax.random.uniform(k1, (3 * hid_dim, d_in), jnp.float32, -k, k)
        w_hh = jax.random.uniform(k2, (3 * hid_dim, hid_dim), jnp.float32, -k, k)
        b_ih = jax.random.uniform(k3, (3 * hid_dim,), jnp.float32, -k, k)
        b_hh = jax.random.uniform(k4, (3 * hid_dim,), jnp.float32, -k, k)
        params.append((w_ih, w_hh, b_ih, b_hh))
    return params


def grucpc_forward(x, h0, pos, neg, params, batch_size):
    """Equivalent of GRUCPC.forward(x, h, pos, neg) -> (out, h, loss)."""
    layer_in = x
    h_finals = []
    for layer, (w_ih, w_hh, b_ih, b_hh) in enumerate(params):
        layer_out, hT = gru_layer(layer_in, h0[layer], w_ih, w_hh, b_ih, b_hh)
        h_finals.append(hT)
        layer_in = layer_out
    h_final = jnp.stack(h_finals, axis=0)                 # (L, B, H)
    loss = contrastive_loss_total(h_final, pos, neg, batch_size)
    return layer_out, h_final, loss


# ----------------------------------------------------------------------------
if __name__ == "__main__":
    in_dim, hid_dim, nlayers = 16, 32, 2
    seq_len, batch_size, n_pairs = 8, 2, 3

    key = jax.random.PRNGKey(0)
    key, kx, kp, kn, kparam = jax.random.split(key, 5)

    x = jax.random.normal(kx, (seq_len, batch_size, in_dim), jnp.float32)
    h0 = jnp.zeros((nlayers, batch_size, hid_dim), jnp.float32)   # init_hidden()
    pos = jax.random.normal(kp, (n_pairs, nlayers, batch_size, hid_dim),
                            jnp.float32)
    neg = jax.random.normal(kn, (n_pairs, nlayers, batch_size, hid_dim),
                            jnp.float32)

    params = init_gru_params(kparam, in_dim, hid_dim, nlayers)

    out, h, loss = grucpc_forward(x, h0, pos, neg, params, batch_size)
    jax.block_until_ready((out, h, loss))

    assert out.shape == (seq_len, batch_size, hid_dim)
    assert h.shape == (nlayers, batch_size, hid_dim)
    assert loss.shape == ()
    print("KERNEL_OK")
</pallas_src>

<mosaic_0001>
module attributes {stable_mosaic.version = 11 : i64} {
  func.func @_gru_layer_kernel(%arg0: memref<8x2x32xf32, #tpu.memory_space<vmem>>, %arg1: memref<8x2x32xf32, #tpu.memory_space<vmem>>, %arg2: memref<8x2x32xf32, #tpu.memory_space<vmem>>, %arg3: memref<32x32xf32, #tpu.memory_space<vmem>>, %arg4: memref<32x32xf32, #tpu.memory_space<vmem>>, %arg5: memref<32x32xf32, #tpu.memory_space<vmem>>, %arg6: memref<1x32xf32, #tpu.memory_space<vmem>>, %arg7: memref<2x32xf32, #tpu.memory_space<vmem>>, %arg8: memref<8x2x32xf32, #tpu.memory_space<vmem>>, %arg9: memref<2x32xf32, #tpu.memory_space<vmem>>) attributes {dimension_semantics = [], scalar_prefetch = 0 : i64, scratch_operands = 0 : i64, tpu.core_type = #tpu.core_type<tc>} {
    %c0 = arith.constant 0 : index
    %c0_0 = arith.constant 0 : index
    %0 = vector.load %arg3[%c0, %c0_0] : memref<32x32xf32, #tpu.memory_space<vmem>>, vector<32x32xf32>
    %c0_1 = arith.constant 0 : index
    %c0_2 = arith.constant 0 : index
    %1 = vector.load %arg4[%c0_1, %c0_2] : memref<32x32xf32, #tpu.memory_space<vmem>>, vector<32x32xf32>
    %c0_3 = arith.constant 0 : index
    %c0_4 = arith.constant 0 : index
    %2 = vector.load %arg5[%c0_3, %c0_4] : memref<32x32xf32, #tpu.memory_space<vmem>>, vector<32x32xf32>
    %c0_5 = arith.constant 0 : index
    %c0_6 = arith.constant 0 : index
    %3 = vector.load %arg6[%c0_5, %c0_6] : memref<1x32xf32, #tpu.memory_space<vmem>>, vector<1x32xf32>
    %c0_7 = arith.constant 0 : index
    %c0_8 = arith.constant 0 : index
    %4 = vector.load %arg7[%c0_7, %c0_8] : memref<2x32xf32, #tpu.memory_space<vmem>>, vector<2x32xf32>
    %c0_i32 = arith.constant 0 : i32
    %5 = arith.index_cast %c0_i32 : i32 to index
    %c0_9 = arith.constant 0 : index
    %c0_10 = arith.constant 0 : index
    %6 = vector.load %arg0[%5, %c0_9, %c0_10] : memref<8x2x32xf32, #tpu.memory_space<vmem>>, vector<1x2x32xf32>
    %7 = vector.shape_cast %6 : vector<1x2x32xf32> to vector<2x32xf32>
    %8 = arith.index_cast %c0_i32 : i32 to index
    %c0_11 = arith.constant 0 : index
    %c0_12 = arith.constant 0 : index
    %9 = vector.load %arg1[%8, %c0_11, %c0_12] : memref<8x2x32xf32, #tpu.memory_space<vmem>>, vector<1x2x32xf32>
    %10 = vector.shape_cast %9 : vector<1x2x32xf32> to vector<2x32xf32>
    %11 = arith.index_cast %c0_i32 : i32 to index
    %c0_13 = arith.constant 0 : index
    %c0_14 = arith.constant 0 : index
    %12 = vector.load %arg2[%11, %c0_13, %c0_14] : memref<8x2x32xf32, #tpu.memory_space<vmem>>, vector<1x2x32xf32>
    %13 = vector.shape_cast %12 : vector<1x2x32xf32> to vector<2x32xf32>
    %cst = arith.constant dense<0.000000e+00> : vector<2x32xf32>
    %14 = tpu.matmul %4, %0, %cst {dimension_numbers = #tpu.dot_dimension_numbers<[1], [0], [0], [1], [0, 0, 1, 1], [], []>} : vector<2x32xf32>, vector<32x32xf32>, vector<2x32xf32> -> vector<2x32xf32>
    %cst_15 = arith.constant dense<0.000000e+00> : vector<2x32xf32>
    %15 = tpu.matmul %4, %1, %cst_15 {dimension_numbers = #tpu.dot_dimension_numbers<[1], [0], [0], [1], [0, 0, 1, 1], [], []>} : vector<2x32xf32>, vector<32x32xf32>, vector<2x32xf32> -> vector<2x32xf32>
    %cst_16 = arith.constant dense<0.000000e+00> : vector<2x32xf32>
    %16 = tpu.matmul %4, %2, %cst_16 {dimension_numbers = #tpu.dot_dimension_numbers<[1], [0], [0], [1], [0, 0, 1, 1], [], []>} : vector<2x32xf32>, vector<32x32xf32>, vector<2x32xf32> -> vector<2x32xf32>
    %17 = vector.broadcast %3 : vector<1x32xf32> to vector<2x32xf32>
    %18 = arith.addf %16, %17 : vector<2x32xf32>
    %19 = arith.addf %7, %14 : vector<2x32xf32>
    %20 = arith.negf %19 : vector<2x32xf32>
    %21 = math.exp %20 : vector<2x32xf32>
    %cst_17 = arith.constant 1.000000e+00 : f32
    %22 = vector.broadcast %cst_17 : f32 to vector<2x32xf32>
    %23 = arith.addf %22, %21 : vector<2x32xf32>
    %24 = arith.divf %22, %23 : vector<2x32xf32>
    %25 = arith.addf %10, %15 : vector<2x32xf32>
    %26 = arith.negf %25 : vector<2x32xf32>
    %27 = math.exp %26 : vector<2x32xf32>
    %cst_18 = arith.constant 1.000000e+00 : f32
    %28 = vector.broadcast %cst_18 : f32 to vector<2x32xf32>
    %29 = arith.addf %28, %27 : vector<2x32xf32>
    %30 = arith.divf %28, %29 : vector<2x32xf32>
    %31 = arith.mulf %24, %18 : vector<2x32xf32>
    %32 = arith.addf %13, %31 : vector<2x32xf32>
    %33 = math.tanh %32 : vector<2x32xf32>
    %cst_19 = arith.constant 1.000000e+00 : f32
    %34 = vector.broadcast %cst_19 : f32 to vector<2x32xf32>
    %35 = arith.subf %34, %30 : vector<2x32xf32>
    %36 = arith.mulf %35, %33 : vector<2x32xf32>
    %37 = arith.mulf %30, %4 : vector<2x32xf32>
    %38 = arith.addf %36, %37 : vector<2x32xf32>
    %39 = arith.index_cast %c0_i32 : i32 to index
    %c0_20 = arith.constant 0 : index
    %c0_21 = arith.constant 0 : index
    %40 = vector.load %arg8[%39, %c0_20, %c0_21] : memref<8x2x32xf32, #tpu.memory_space<vmem>>, vector<1x2x32xf32>
    %41 = vector.shape_cast %40 : vector<1x2x32xf32> to vector<2x32xf32>
    %42 = vector.shape_cast %38 : vector<2x32xf32> to vector<1x2x32xf32>
    tpu.vector_store %arg8[%39, %c0_20, %c0_21], %42 {strides = array<i32>} : memref<8x2x32xf32, #tpu.memory_space<vmem>>, vector<1x2x32xf32>,
    %c1_i32 = arith.constant 1 : i32
    %43 = arith.index_cast %c1_i32 : i32 to index
    %c0_22 = arith.constant 0 : index
    %c0_23 = arith.constant 0 : index
    %44 = vector.load %arg0[%43, %c0_22, %c0_23] : memref<8x2x32xf32, #tpu.memory_space<vmem>>, vector<1x2x32xf32>
    %45 = vector.shape_cast %44 : vector<1x2x32xf32> to vector<2x32xf32>
    %46 = arith.index_cast %c1_i32 : i32 to index
    %c0_24 = arith.constant 0 : index
    %c0_25 = arith.constant 0 : index
    %47 = vector.load %arg1[%46, %c0_24, %c0_25] : memref<8x2x32xf32, #tpu.memory_space<vmem>>, vector<1x2x32xf32>
    %48 = vector.shape_cast %47 : vector<1x2x32xf32> to vector<2x32xf32>
    %49 = arith.index_cast %c1_i32 : i32 to index
    %c0_26 = arith.constant 0 : index
    %c0_27 = arith.constant 0 : index
    %50 = vector.load %arg2[%49, %c0_26, %c0_27] : memref<8x2x32xf32, #tpu.memory_space<vmem>>, vector<1x2x32xf32>
    %51 = vector.shape_cast %50 : vector<1x2x32xf32> to vector<2x32xf32>
    %cst_28 = arith.constant dense<0.000000e+00> : vector<2x32xf32>
    %52 = tpu.matmul %38, %0, %cst_28 {dimension_numbers = #tpu.dot_dimension_numbers<[1], [0], [0], [1], [0, 0, 1, 1], [], []>} : vector<2x32xf32>, vector<32x32xf32>, vector<2x32xf32> -> vector<2x32xf32>
    %cst_29 = arith.constant dense<0.000000e+00> : vector<2x32xf32>
    %53 = tpu.matmul %38, %1, %cst_29 {dimension_numbers = #tpu.dot_dimension_numbers<[1], [0], [0], [1], [0, 0, 1, 1], [], []>} : vector<2x32xf32>, vector<32x32xf32>, vector<2x32xf32> -> vector<2x32xf32>
    %cst_30 = arith.constant dense<0.000000e+00> : vector<2x32xf32>
    %54 = tpu.matmul %38, %2, %cst_30 {dimension_numbers = #tpu.dot_dimension_numbers<[1], [0], [0], [1], [0, 0, 1, 1], [], []>} : vector<2x32xf32>, vector<32x32xf32>, vector<2x32xf32> -> vector<2x32xf32>
    %55 = vector.broadcast %3 : vector<1x32xf32> to vector<2x32xf32>
    %56 = arith.addf %54, %55 : vector<2x32xf32>
    %57 = arith.addf %45, %52 : vector<2x32xf32>
    %58 = arith.negf %57 : vector<2x32xf32>
    %59 = math.exp %58 : vector<2x32xf32>
    %cst_31 = arith.constant 1.000000e+00 : f32
    %60 = vector.broadcast %cst_31 : f32 to vector<2x32xf32>
    %61 = arith.addf %60, %59 : vector<2x32xf32>
    %62 = arith.divf %60, %61 : vector<2x32xf32>
    %63 = arith.addf %48, %53 : vector<2x32xf32>
    %64 = arith.negf %63 : vector<2x32xf32>
    %65 = math.exp %64 : vector<2x32xf32>
    %cst_32 = arith.constant 1.000000e+00 : f32
    %66 = vector.broadcast %cst_32 : f32 to vector<2x32xf32>
    %67 = arith.addf %66, %65 : vector<2x32xf32>
    %68 = arith.divf %66, %67 : vector<2x32xf32>
    %69 = arith.mulf %62, %56 : vector<2x32xf32>
    %70 = arith.addf %51, %69 : vector<2x32xf32>
    %71 = math.tanh %70 : vector<2x32xf32>
    %cst_33 = arith.constant 1.000000e+00 : f32
    %72 = vector.broadcast %cst_33 : f32 to vector<2x32xf32>
    %73 = arith.subf %72, %68 : vector<2x32xf32>
    %74 = arith.mulf %73, %71 : vector<2x32xf32>
    %75 = arith.mulf %68, %38 : vector<2x32xf32>
    %76 = arith.addf %74, %75 : vector<2x32xf32>
    %77 = arith.index_cast %c1_i32 : i32 to index
    %c0_34 = arith.constant 0 : index
    %c0_35 = arith.constant 0 : index
    %78 = vector.load %arg8[%77, %c0_34, %c0_35] : memref<8x2x32xf32, #tpu.memory_space<vmem>>, vector<1x2x32xf32>
    %79 = vector.shape_cast %78 : vector<1x2x32xf32> to vector<2x32xf32>
    %80 = vector.shape_cast %76 : vector<2x32xf32> to vector<1x2x32xf32>
    tpu.vector_store %arg8[%77, %c0_34, %c0_35], %80 {strides = array<i32>} : memref<8x2x32xf32, #tpu.memory_space<vmem>>, vector<1x2x32xf32>,
    %c2_i32 = arith.constant 2 : i32
    %81 = arith.index_cast %c2_i32 : i32 to index
    %c0_36 = arith.constant 0 : index
    %c0_37 = arith.constant 0 : index
    %82 = vector.load %arg0[%81, %c0_36, %c0_37] : memref<8x2x32xf32, #tpu.memory_space<vmem>>, vector<1x2x32xf32>
    %83 = vector.shape_cast %82 : vector<1x2x32xf32> to vector<2x32xf32>
    %84 = arith.index_cast %c2_i32 : i32 to index
    %c0_38 = arith.constant 0 : index
    %c0_39 = arith.constant 0 : index
    %85 = vector.load %arg1[%84, %c0_38, %c0_39] : memref<8x2x32xf32, #tpu.memory_space<vmem>>, vector<1x2x32xf32>
    %86 = vector.shape_cast %85 : vector<1x2x32xf32> to vector<2x32xf32>
    %87 = arith.index_cast %c2_i32 : i32 to index
    %c0_40 = arith.constant 0 : index
    %c0_41 = arith.constant 0 : index
    %88 = vector.load %arg2[%87, %c0_40, %c0_41] : memref<8x2x32xf32, #tpu.memory_space<vmem>>, vector<1x2x32xf32>
    %89 = vector.shape_cast %88 : vector<1x2x32xf32> to vector<2x32xf32>
    %cst_42 = arith.constant dense<0.000000e+00> : vector<2x32xf32>
    %90 = tpu.matmul %76, %0, %cst_42 {dimension_numbers = #tpu.dot_dimension_numbers<[1], [0], [0], [1], [0, 0, 1, 1], [], []>} : vector<2x32xf32>, vector<32x32xf32>, vector<2x32xf32> -> vector<2x32xf32>
    %cst_43 = arith.constant dense<0.000000e+00> : vector<2x32xf32>
    %91 = tpu.matmul %76, %1, %cst_43 {dimension_numbers = #tpu.dot_dimension_numbers<[1], [0], [0], [1], [0, 0, 1, 1], [], []>} : vector<2x32xf32>, vector<32x32xf32>, vector<2x32xf32> -> vector<2x32xf32>
    %cst_44 = arith.constant dense<0.000000e+00> : vector<2x32xf32>
    %92 = tpu.matmul %76, %2, %cst_44 {dimension_numbers = #tpu.dot_dimension_numbers<[1], [0], [0], [1], [0, 0, 1, 1], [], []>} : vector<2x32xf32>, vector<32x32xf32>, vector<2x32xf32> -> vector<2x32xf32>
    %93 = vector.broadcast %3 : vector<1x32xf32> to vector<2x32xf32>
    %94 = arith.addf %92, %93 : vector<2x32xf32>
    %95 = arith.addf %83, %90 : vector<2x32xf32>
    %96 = arith.negf %95 : vector<2x32xf32>
    %97 = math.exp %96 : vector<2x32xf32>
    %cst_45 = arith.constant 1.000000e+00 : f32
    %98 = vector.broadcast %cst_45 : f32 to vector<2x32xf32>
    %99 = arith.addf %98, %97 : vector<2x32xf32>
    %100 = arith.divf %98, %99 : vector<2x32xf32>
    %101 = arith.addf %86, %91 : vector<2x32xf32>
    %102 = arith.negf %101 : vector<2x32xf32>
    %103 = math.exp %102 : vector<2x32xf32>
    %cst_46 = arith.constant 1.000000e+00 : f32
    %104 = vector.broadcast %cst_46 : f32 to vector<2x32xf32>
    %105 = arith.addf %104, %103 : vector<2x32xf32>
    %106 = arith.divf %104, %105 : vector<2x32xf32>
    %107 = arith.mulf %100, %94 : vector<2x32xf32>
    %108 = arith.addf %89, %107 : vector<2x32xf32>
    %109 = math.tanh %108 : vector<2x32xf32>
    %cst_47 = arith.constant 1.000000e+00 : f32
    %110 = vector.broadcast %cst_47 : f32 to vector<2x32xf32>
    %111 = arith.subf %110, %106 : vector<2x32xf32>
    %112 = arith.mulf %111, %109 : vector<2x32xf32>
    %113 = arith.mulf %106, %76 : vector<2x32xf32>
    %114 = arith.addf %112, %113 : vector<2x32xf32>
    %115 = arith.index_cast %c2_i32 : i32 to index
    %c0_48 = arith.constant 0 : index
    %c0_49 = arith.constant 0 : index
    %116 = vector.load %arg8[%115, %c0_48, %c0_49] : memref<8x2x32xf32, #tpu.memory_space<vmem>>, vector<1x2x32xf32>
    %117 = vector.shape_cast %116 : vector<1x2x32xf32> to vector<2x32xf32>
    %118 = vector.shape_cast %114 : vector<2x32xf32> to vector<1x2x32xf32>
    tpu.vector_store %arg8[%115, %c0_48, %c0_49], %118 {strides = array<i32>} : memref<8x2x32xf32, #tpu.memory_space<vmem>>, vector<1x2x32xf32>,
    %c3_i32 = arith.constant 3 : i32
    %119 = arith.index_cast %c3_i32 : i32 to index
    %c0_50 = arith.constant 0 : index
    %c0_51 = arith.constant 0 : index
    %120 = vector.load %arg0[%119, %c0_50, %c0_51] : memref<8x2x32xf32, #tpu.memory_space<vmem>>, vector<1x2x32xf32>
    %121 = vector.shape_cast %120 : vector<1x2x32xf32> to vector<2x32xf32>
    %122 = arith.index_cast %c3_i32 : i32 to index
    %c0_52 = arith.constant 0 : index
    %c0_53 = arith.constant 0 : index
    %123 = vector.load %arg1[%122, %c0_52, %c0_53] : memref<8x2x32xf32, #tpu.memory_space<vmem>>, vector<1x2x32xf32>
    %124 = vector.shape_cast %123 : vector<1x2x32xf32> to vector<2x32xf32>
    %125 = arith.index_cast %c3_i32 : i32 to index
    %c0_54 = arith.constant 0 : index
    %c0_55 = arith.constant 0 : index
    %126 = vector.load %arg2[%125, %c0_54, %c0_55] : memref<8x2x32xf32, #tpu.memory_space<vmem>>, vector<1x2x32xf32>
    %127 = vector.shape_cast %126 : vector<1x2x32xf32> to vector<2x32xf32>
    %cst_56 = arith.constant dense<0.000000e+00> : vector<2x32xf32>
    %128 = tpu.matmul %114, %0, %cst_56 {dimension_numbers = #tpu.dot_dimension_numbers<[1], [0], [0], [1], [0, 0, 1, 1], [], []>} : vector<2x32xf32>, vector<32x32xf32>, vector<2x32xf32> -> vector<2x32xf32>
    %cst_57 = arith.constant dense<0.000000e+00> : vector<2x32xf32>
    %129 = tpu.matmul %114, %1, %cst_57 {dimension_numbers = #tpu.dot_dimension_numbers<[1], [0], [0], [1], [0, 0, 1, 1], [], []>} : vector<2x32xf32>, vector<32x32xf32>, vector<2x32xf32> -> vector<2x32xf32>
    %cst_58 = arith.constant dense<0.000000e+00> : vector<2x32xf32>
    %130 = tpu.matmul %114, %2, %cst_58 {dimension_numbers = #tpu.dot_dimension_numbers<[1], [0], [0], [1], [0, 0, 1, 1], [], []>} : vector<2x32xf32>, vector<32x32xf32>, vector<2x32xf32> -> vector<2x32xf32>
    %131 = vector.broadcast %3 : vector<1x32xf32> to vector<2x32xf32>
    %132 = arith.addf %130, %131 : vector<2x32xf32>
    %133 = arith.addf %121, %128 : vector<2x32xf32>
    %134 = arith.negf %133 : vector<2x32xf32>
    %135 = math.exp %134 : vector<2x32xf32>
    %cst_59 = arith.constant 1.000000e+00 : f32
    %136 = vector.broadcast %cst_59 : f32 to vector<2x32xf32>
    %137 = arith.addf %136, %135 : vector<2x32xf32>
    %138 = arith.divf %136, %137 : vector<2x32xf32>
    %139 = arith.addf %124, %129 : vector<2x32xf32>
    %140 = arith.negf %139 : vector<2x32xf32>
    %141 = math.exp %140 : vector<2x32xf32>
    %cst_60 = arith.constant 1.000000e+00 : f32
    %142 = vector.broadcast %cst_60 : f32 to vector<2x32xf32>
    %143 = arith.addf %142, %141 : vector<2x32xf32>
    %144 = arith.divf %142, %143 : vector<2x32xf32>
    %145 = arith.mulf %138, %132 : vector<2x32xf32>
    %146 = arith.addf %127, %145 : vector<2x32xf32>
    %147 = math.tanh %146 : vector<2x32xf32>
    %cst_61 = arith.constant 1.000000e+00 : f32
    %148 = vector.broadcast %cst_61 : f32 to vector<2x32xf32>
    %149 = arith.subf %148, %144 : vector<2x32xf32>
    %150 = arith.mulf %149, %147 : vector<2x32xf32>
    %151 = arith.mulf %144, %114 : vector<2x32xf32>
    %152 = arith.addf %150, %151 : vector<2x32xf32>
    %153 = arith.index_cast %c3_i32 : i32 to index
    %c0_62 = arith.constant 0 : index
    %c0_63 = arith.constant 0 : index
    %154 = vector.load %arg8[%153, %c0_62, %c0_63] : memref<8x2x32xf32, #tpu.memory_space<vmem>>, vector<1x2x32xf32>
    %155 = vector.shape_cast %154 : vector<1x2x32xf32> to vector<2x32xf32>
    %156 = vector.shape_cast %152 : vector<2x32xf32> to vector<1x2x32xf32>
    tpu.vector_store %arg8[%153, %c0_62, %c0_63], %156 {strides = array<i32>} : memref<8x2x32xf32, #tpu.memory_space<vmem>>, vector<1x2x32xf32>,
    %c4_i32 = arith.constant 4 : i32
    %157 = arith.index_cast %c4_i32 : i32 to index
    %c0_64 = arith.constant 0 : index
    %c0_65 = arith.constant 0 : index
    %158 = vector.load %arg0[%157, %c0_64, %c0_65] : memref<8x2x32xf32, #tpu.memory_space<vmem>>, vector<1x2x32xf32>
    %159 = vector.shape_cast %158 : vector<1x2x32xf32> to vector<2x32xf32>
    %160 = arith.index_cast %c4_i32 : i32 to index
    %c0_66 = arith.constant 0 : index
    %c0_67 = arith.constant 0 : index
    %161 = vector.load %arg1[%160, %c0_66, %c0_67] : memref<8x2x32xf32, #tpu.memory_space<vmem>>, vector<1x2x32xf32>
    %162 = vector.shape_cast %161 : vector<1x2x32xf32> to vector<2x32xf32>
    %163 = arith.index_cast %c4_i32 : i32 to index
    %c0_68 = arith.constant 0 : index
    %c0_69 = arith.constant 0 : index
    %164 = vector.load %arg2[%163, %c0_68, %c0_69] : memref<8x2x32xf32, #tpu.memory_space<vmem>>, vector<1x2x32xf32>
    %165 = vector.shape_cast %164 : vector<1x2x32xf32> to vector<2x32xf32>
    %cst_70 = arith.constant dense<0.000000e+00> : vector<2x32xf32>
    %166 = tpu.matmul %152, %0, %cst_70 {dimension_numbers = #tpu.dot_dimension_numbers<[1], [0], [0], [1], [0, 0, 1, 1], [], []>} : vector<2x32xf32>, vector<32x32xf32>, vector<2x32xf32> -> vector<2x32xf32>
    %cst_71 = arith.constant dense<0.000000e+00> : vector<2x32xf32>
    %167 = tpu.matmul %152, %1, %cst_71 {dimension_numbers = #tpu.dot_dimension_numbers<[1], [0], [0], [1], [0, 0, 1, 1], [], []>} : vector<2x32xf32>, vector<32x32xf32>, vector<2x32xf32> -> vector<2x32xf32>
    %cst_72 = arith.constant dense<0.000000e+00> : vector<2x32xf32>
    %168 = tpu.matmul %152, %2, %cst_72 {dimension_numbers = #tpu.dot_dimension_numbers<[1], [0], [0], [1], [0, 0, 1, 1], [], []>} : vector<2x32xf32>, vector<32x32xf32>, vector<2x32xf32> -> vector<2x32xf32>
    %169 = vector.broadcast %3 : vector<1x32xf32> to vector<2x32xf32>
    %170 = arith.addf %168, %169 : vector<2x32xf32>
    %171 = arith.addf %159, %166 : vector<2x32xf32>
    %172 = arith.negf %171 : vector<2x32xf32>
    %173 = math.exp %172 : vector<2x32xf32>
    %cst_73 = arith.constant 1.000000e+00 : f32
    %174 = vector.broadcast %cst_73 : f32 to vector<2x32xf32>
    %175 = arith.addf %174, %173 : vector<2x32xf32>
    %176 = arith.divf %174, %175 : vector<2x32xf32>
    %177 = arith.addf %162, %167 : vector<2x32xf32>
    %178 = arith.negf %177 : vector<2x32xf32>
    %179 = math.exp %178 : vector<2x32xf32>
    %cst_74 = arith.constant 1.000000e+00 : f32
    %180 = vector.broadcast %cst_74 : f32 to vector<2x32xf32>
    %181 = arith.addf %180, %179 : vector<2x32xf32>
    %182 = arith.divf %180, %181 : vector<2x32xf32>
    %183 = arith.mulf %176, %170 : vector<2x32xf32>
    %184 = arith.addf %165, %183 : vector<2x32xf32>
    %185 = math.tanh %184 : vector<2x32xf32>
    %cst_75 = arith.constant 1.000000e+00 : f32
    %186 = vector.broadcast %cst_75 : f32 to vector<2x32xf32>
    %187 = arith.subf %186, %182 : vector<2x32xf32>
    %188 = arith.mulf %187, %185 : vector<2x32xf32>
    %189 = arith.mulf %182, %152 : vector<2x32xf32>
    %190 = arith.addf %188, %189 : vector<2x32xf32>
    %191 = arith.index_cast %c4_i32 : i32 to index
    %c0_76 = arith.constant 0 : index
    %c0_77 = arith.constant 0 : index
    %192 = vector.load %arg8[%191, %c0_76, %c0_77] : memref<8x2x32xf32, #tpu.memory_space<vmem>>, vector<1x2x32xf32>
    %193 = vector.shape_cast %192 : vector<1x2x32xf32> to vector<2x32xf32>
    %194 = vector.shape_cast %190 : vector<2x32xf32> to vector<1x2x32xf32>
    tpu.vector_store %arg8[%191, %c0_76, %c0_77], %194 {strides = array<i32>} : memref<8x2x32xf32, #tpu.memory_space<vmem>>, vector<1x2x32xf32>,
    %c5_i32 = arith.constant 5 : i32
    %195 = arith.index_cast %c5_i32 : i32 to index
    %c0_78 = arith.constant 0 : index
    %c0_79 = arith.constant 0 : index
    %196 = vector.load %arg0[%195, %c0_78, %c0_79] : memref<8x2x32xf32, #tpu.memory_space<vmem>>, vector<1x2x32xf32>
    %197 = vector.shape_cast %196 : vector<1x2x32xf32> to vector<2x32xf32>
    %198 = arith.index_cast %c5_i32 : i32 to index
    %c0_80 = arith.constant 0 : index
    %c0_81 = arith.constant 0 : index
    %199 = vector.load %arg1[%198, %c0_80, %c0_81] : memref<8x2x32xf32, #tpu.memory_space<vmem>>, vector<1x2x32xf32>
    %200 = vector.shape_cast %199 : vector<1x2x32xf32> to vector<2x32xf32>
    %201 = arith.index_cast %c5_i32 : i32 to index
    %c0_82 = arith.constant 0 : index
    %c0_83 = arith.constant 0 : index
    %202 = vector.load %arg2[%201, %c0_82, %c0_83] : memref<8x2x32xf32, #tpu.memory_space<vmem>>, vector<1x2x32xf32>
    %203 = vector.shape_cast %202 : vector<1x2x32xf32> to vector<2x32xf32>
    %cst_84 = arith.constant dense<0.000000e+00> : vector<2x32xf32>
    %204 = tpu.matmul %190, %0, %cst_84 {dimension_numbers = #tpu.dot_dimension_numbers<[1], [0], [0], [1], [0, 0, 1, 1], [], []>} : vector<2x32xf32>, vector<32x32xf32>, vector<2x32xf32> -> vector<2x32xf32>
    %cst_85 = arith.constant dense<0.000000e+00> : vector<2x32xf32>
    %205 = tpu.matmul %190, %1, %cst_85 {dimension_numbers = #tpu.dot_dimension_numbers<[1], [0], [0], [1], [0, 0, 1, 1], [], []>} : vector<2x32xf32>, vector<32x32xf32>, vector<2x32xf32> -> vector<2x32xf32>
    %cst_86 = arith.constant dense<0.000000e+00> : vector<2x32xf32>
    %206 = tpu.matmul %190, %2, %cst_86 {dimension_numbers = #tpu.dot_dimension_numbers<[1], [0], [0], [1], [0, 0, 1, 1], [], []>} : vector<2x32xf32>, vector<32x32xf32>, vector<2x32xf32> -> vector<2x32xf32>
    %207 = vector.broadcast %3 : vector<1x32xf32> to vector<2x32xf32>
    %208 = arith.addf %206, %207 : vector<2x32xf32>
    %209 = arith.addf %197, %204 : vector<2x32xf32>
    %210 = arith.negf %209 : vector<2x32xf32>
    %211 = math.exp %210 : vector<2x32xf32>
    %cst_87 = arith.constant 1.000000e+00 : f32
    %212 = vector.broadcast %cst_87 : f32 to vector<2x32xf32>
    %213 = arith.addf %212, %211 : vector<2x32xf32>
    %214 = arith.divf %212, %213 : vector<2x32xf32>
    %215 = arith.addf %200, %205 : vector<2x32xf32>
    %216 = arith.negf %215 : vector<2x32xf32>
    %217 = math.exp %216 : vector<2x32xf32>
    %cst_88 = arith.constant 1.000000e+00 : f32
    %218 = vector.broadcast %cst_88 : f32 to vector<2x32xf32>
    %219 = arith.addf %218, %217 : vector<2x32xf32>
    %220 = arith.divf %218, %219 : vector<2x32xf32>
    %221 = arith.mulf %214, %208 : vector<2x32xf32>
    %222 = arith.addf %203, %221 : vector<2x32xf32>
    %223 = math.tanh %222 : vector<2x32xf32>
    %cst_89 = arith.constant 1.000000e+00 : f32
    %224 = vector.broadcast %cst_89 : f32 to vector<2x32xf32>
    %225 = arith.subf %224, %220 : vector<2x32xf32>
    %226 = arith.mulf %225, %223 : vector<2x32xf32>
    %227 = arith.mulf %220, %190 : vector<2x32xf32>
    %228 = arith.addf %226, %227 : vector<2x32xf32>
    %229 = arith.index_cast %c5_i32 : i32 to index
    %c0_90 = arith.constant 0 : index
    %c0_91 = arith.constant 0 : index
    %230 = vector.load %arg8[%229, %c0_90, %c0_91] : memref<8x2x32xf32, #tpu.memory_space<vmem>>, vector<1x2x32xf32>
    %231 = vector.shape_cast %230 : vector<1x2x32xf32> to vector<2x32xf32>
    %232 = vector.shape_cast %228 : vector<2x32xf32> to vector<1x2x32xf32>
    tpu.vector_store %arg8[%229, %c0_90, %c0_91], %232 {strides = array<i32>} : memref<8x2x32xf32, #tpu.memory_space<vmem>>, vector<1x2x32xf32>,
    %c6_i32 = arith.constant 6 : i32
    %233 = arith.index_cast %c6_i32 : i32 to index
    %c0_92 = arith.constant 0 : index
    %c0_93 = arith.constant 0 : index
    %234 = vector.load %arg0[%233, %c0_92, %c0_93] : memref<8x2x32xf32, #tpu.memory_space<vmem>>, vector<1x2x32xf32>
    %235 = vector.shape_cast %234 : vector<1x2x32xf32> to vector<2x32xf32>
    %236 = arith.index_cast %c6_i32 : i32 to index
    %c0_94 = arith.constant 0 : index
    %c0_95 = arith.constant 0 : index
    %237 = vector.load %arg1[%236, %c0_94, %c0_95] : memref<8x2x32xf32, #tpu.memory_space<vmem>>, vector<1x2x32xf32>
    %238 = vector.shape_cast %237 : vector<1x2x32xf32> to vector<2x32xf32>
    %239 = arith.index_cast %c6_i32 : i32 to index
    %c0_96 = arith.constant 0 : index
    %c0_97 = arith.constant 0 : index
    %240 = vector.load %arg2[%239, %c0_96, %c0_97] : memref<8x2x32xf32, #tpu.memory_space<vmem>>, vector<1x2x32xf32>
    %241 = vector.shape_cast %240 : vector<1x2x32xf32> to vector<2x32xf32>
    %cst_98 = arith.constant dense<0.000000e+00> : vector<2x32xf32>
    %242 = tpu.matmul %228, %0, %cst_98 {dimension_numbers = #tpu.dot_dimension_numbers<[1], [0], [0], [1], [0, 0, 1, 1], [], []>} : vector<2x32xf32>, vector<32x32xf32>, vector<2x32xf32> -> vector<2x32xf32>
    %cst_99 = arith.constant dense<0.000000e+00> : vector<2x32xf32>
    %243 = tpu.matmul %228, %1, %cst_99 {dimension_numbers = #tpu.dot_dimension_numbers<[1], [0], [0], [1], [0, 0, 1, 1], [], []>} : vector<2x32xf32>, vector<32x32xf32>, vector<2x32xf32> -> vector<2x32xf32>
    %cst_100 = arith.constant dense<0.000000e+00> : vector<2x32xf32>
    %244 = tpu.matmul %228, %2, %cst_100 {dimension_numbers = #tpu.dot_dimension_numbers<[1], [0], [0], [1], [0, 0, 1, 1], [], []>} : vector<2x32xf32>, vector<32x32xf32>, vector<2x32xf32> -> vector<2x32xf32>
    %245 = vector.broadcast %3 : vector<1x32xf32> to vector<2x32xf32>
    %246 = arith.addf %244, %245 : vector<2x32xf32>
    %247 = arith.addf %235, %242 : vector<2x32xf32>
    %248 = arith.negf %247 : vector<2x32xf32>
    %249 = math.exp %248 : vector<2x32xf32>
    %cst_101 = arith.constant 1.000000e+00 : f32
    %250 = vector.broadcast %cst_101 : f32 to vector<2x32xf32>
    %251 = arith.addf %250, %249 : vector<2x32xf32>
    %252 = arith.divf %250, %251 : vector<2x32xf32>
    %253 = arith.addf %238, %243 : vector<2x32xf32>
    %254 = arith.negf %253 : vector<2x32xf32>
    %255 = math.exp %254 : vector<2x32xf32>
    %cst_102 = arith.constant 1.000000e+00 : f32
    %256 = vector.broadcast %cst_102 : f32 to vector<2x32xf32>
    %257 = arith.addf %256, %255 : vector<2x32xf32>
    %258 = arith.divf %256, %257 : vector<2x32xf32>
    %259 = arith.mulf %252, %246 : vector<2x32xf32>
    %260 = arith.addf %241, %259 : vector<2x32xf32>
    %261 = math.tanh %260 : vector<2x32xf32>
    %cst_103 = arith.constant 1.000000e+00 : f32
    %262 = vector.broadcast %cst_103 : f32 to vector<2x32xf32>
    %263 = arith.subf %262, %258 : vector<2x32xf32>
    %264 = arith.mulf %263, %261 : vector<2x32xf32>
    %265 = arith.mulf %258, %228 : vector<2x32xf32>
    %266 = arith.addf %264, %265 : vector<2x32xf32>
    %267 = arith.index_cast %c6_i32 : i32 to index
    %c0_104 = arith.constant 0 : index
    %c0_105 = arith.constant 0 : index
    %268 = vector.load %arg8[%267, %c0_104, %c0_105] : memref<8x2x32xf32, #tpu.memory_space<vmem>>, vector<1x2x32xf32>
    %269 = vector.shape_cast %268 : vector<1x2x32xf32> to vector<2x32xf32>
    %270 = vector.shape_cast %266 : vector<2x32xf32> to vector<1x2x32xf32>
    tpu.vector_store %arg8[%267, %c0_104, %c0_105], %270 {strides = array<i32>} : memref<8x2x32xf32, #tpu.memory_space<vmem>>, vector<1x2x32xf32>,
    %c7_i32 = arith.constant 7 : i32
    %271 = arith.index_cast %c7_i32 : i32 to index
    %c0_106 = arith.constant 0 : index
    %c0_107 = arith.constant 0 : index
    %272 = vector.load %arg0[%271, %c0_106, %c0_107] : memref<8x2x32xf32, #tpu.memory_space<vmem>>, vector<1x2x32xf32>
    %273 = vector.shape_cast %272 : vector<1x2x32xf32> to vector<2x32xf32>
    %274 = arith.index_cast %c7_i32 : i32 to index
    %c0_108 = arith.constant 0 : index
    %c0_109 = arith.constant 0 : index
    %275 = vector.load %arg1[%274, %c0_108, %c0_109] : memref<8x2x32xf32, #tpu.memory_space<vmem>>, vector<1x2x32xf32>
    %276 = vector.shape_cast %275 : vector<1x2x32xf32> to vector<2x32xf32>
    %277 = arith.index_cast %c7_i32 : i32 to index
    %c0_110 = arith.constant 0 : index
    %c0_111 = arith.constant 0 : index
    %278 = vector.load %arg2[%277, %c0_110, %c0_111] : memref<8x2x32xf32, #tpu.memory_space<vmem>>, vector<1x2x32xf32>
    %279 = vector.shape_cast %278 : vector<1x2x32xf32> to vector<2x32xf32>
    %cst_112 = arith.constant dense<0.000000e+00> : vector<2x32xf32>
    %280 = tpu.matmul %266, %0, %cst_112 {dimension_numbers = #tpu.dot_dimension_numbers<[1], [0], [0], [1], [0, 0, 1, 1], [], []>} : vector<2x32xf32>, vector<32x32xf32>, vector<2x32xf32> -> vector<2x32xf32>
    %cst_113 = arith.constant dense<0.000000e+00> : vector<2x32xf32>
    %281 = tpu.matmul %266, %1, %cst_113 {dimension_numbers = #tpu.dot_dimension_numbers<[1], [0], [0], [1], [0, 0, 1, 1], [], []>} : vector<2x32xf32>, vector<32x32xf32>, vector<2x32xf32> -> vector<2x32xf32>
    %cst_114 = arith.constant dense<0.000000e+00> : vector<2x32xf32>
    %282 = tpu.matmul %266, %2, %cst_114 {dimension_numbers = #tpu.dot_dimension_numbers<[1], [0], [0], [1], [0, 0, 1, 1], [], []>} : vector<2x32xf32>, vector<32x32xf32>, vector<2x32xf32> -> vector<2x32xf32>
    %283 = vector.broadcast %3 : vector<1x32xf32> to vector<2x32xf32>
    %284 = arith.addf %282, %283 : vector<2x32xf32>
    %285 = arith.addf %273, %280 : vector<2x32xf32>
    %286 = arith.negf %285 : vector<2x32xf32>
    %287 = math.exp %286 : vector<2x32xf32>
    %cst_115 = arith.constant 1.000000e+00 : f32
    %288 = vector.broadcast %cst_115 : f32 to vector<2x32xf32>
    %289 = arith.addf %288, %287 : vector<2x32xf32>
    %290 = arith.divf %288, %289 : vector<2x32xf32>
    %291 = arith.addf %276, %281 : vector<2x32xf32>
    %292 = arith.negf %291 : vector<2x32xf32>
    %293 = math.exp %292 : vector<2x32xf32>
    %cst_116 = arith.constant 1.000000e+00 : f32
    %294 = vector.broadcast %cst_116 : f32 to vector<2x32xf32>
    %295 = arith.addf %294, %293 : vector<2x32xf32>
    %296 = arith.divf %294, %295 : vector<2x32xf32>
    %297 = arith.mulf %290, %284 : vector<2x32xf32>
    %298 = arith.addf %279, %297 : vector<2x32xf32>
    %299 = math.tanh %298 : vector<2x32xf32>
    %cst_117 = arith.constant 1.000000e+00 : f32
    %300 = vector.broadcast %cst_117 : f32 to vector<2x32xf32>
    %301 = arith.subf %300, %296 : vector<2x32xf32>
    %302 = arith.mulf %301, %299 : vector<2x32xf32>
    %303 = arith.mulf %296, %266 : vector<2x32xf32>
    %304 = arith.addf %302, %303 : vector<2x32xf32>
    %305 = arith.index_cast %c7_i32 : i32 to index
    %c0_118 = arith.constant 0 : index
    %c0_119 = arith.constant 0 : index
    %306 = vector.load %arg8[%305, %c0_118, %c0_119] : memref<8x2x32xf32, #tpu.memory_space<vmem>>, vector<1x2x32xf32>
    %307 = vector.shape_cast %306 : vector<1x2x32xf32> to vector<2x32xf32>
    %308 = vector.shape_cast %304 : vector<2x32xf32> to vector<1x2x32xf32>
    tpu.vector_store %arg8[%305, %c0_118, %c0_119], %308 {strides = array<i32>} : memref<8x2x32xf32, #tpu.memory_space<vmem>>, vector<1x2x32xf32>,
    %c8_i32 = arith.constant 8 : i32
    %c0_120 = arith.constant 0 : index
    %c0_121 = arith.constant 0 : index
    %309 = vector.load %arg9[%c0_120, %c0_121] : memref<2x32xf32, #tpu.memory_space<vmem>>, vector<2x32xf32>
    tpu.vector_store %arg9[%c0_120, %c0_121], %304 {strides = array<i32>} : memref<2x32xf32, #tpu.memory_space<vmem>>, vector<2x32xf32>,
    return
  }
}

</mosaic_0001>

<bundles_post_ra>
// kernel: tpu_custom_call.1
= control target key start
LH: loop header
LB: loop body
LE: loop exit
PB: predicated region body
PF: predicated region fallthrough
CT: control target
= control target key end

     0   :  { %15 = vsyncpa [#allocation3], 0  ;;  %s1763_s0 = inlined_call_operand.hbm [shape: f32[8,2,32], index: 0, kind: input, shape index: {}]   ;;  %s1764_s1 = inlined_call_operand.hbm [shape: f32[8,2,32], index: 1, kind: input, shape index: {}]   ;;  %s1765_s2 = inlined_call_operand.hbm [shape: f32[8,2,32], index: 2, kind: input, shape index: {}]   ;;  %s1766_s3 = inlined_call_operand.hbm [shape: f32[32,32], index: 3, kind: input, shape index: {}]   ;;  %s1767_s4 = inlined_call_operand.hbm [shape: f32[32,32], index: 4, kind: input, shape index: {}]   ;;  %s1768_s5 = inlined_call_operand.hbm [shape: f32[32,32], index: 5, kind: input, shape index: {}]   ;;  %s1769_s6 = inlined_call_operand.vmem [shape: f32[1,32], index: 6, kind: input, shape index: {}]   ;;  %s1770_s7 = inlined_call_operand.vmem [shape: f32[2,32], index: 7, kind: input, shape index: {}]   ;;  %s1771_s8 = inlined_call_operand.hbm [shape: f32[8,2,32], index: 8, kind: output, shape index: {0}]   ;;  %s1772_s9 = inlined_call_operand.hbm [shape: f32[2,32], index: 9, kind: output, shape index: {1}]  }
   0x1   :  { %16 = vsyncpa [#allocation6], 0 }
   0x2   :  { %17 = vsyncpa [#allocation9], 0 }
   0x3   :  { %18 = vsyncpa [#allocation12], 0 }
   0x4   :  { %19 = vsyncpa [#allocation4], 0 }
   0x5   :  { %20 = vsyncpa [#allocation15], 0  ;;  %s38_s11 = sshll.u32 %s1764_s1, 4  ;;  %s1462_s12 = smov [#allocation5]   ;;  %s39_s11 = int_to_ptr.hbm [resolvable:$true] %s38_s11 }
   0x6   :  { %s40_s13 = sshll.u32 %s1462_s12, 4  ;;  %s64_s16 = sshll.u32 %s1766_s3, 4  ;;  %s41_s13 = int_to_ptr.vmem [resolvable:$true] %s40_s13  ;;  %s65_s16 = int_to_ptr.hbm [resolvable:$true] %s64_s16 }
   0x7   :  { %s1463_s17 = smov 32   ;;  %s1464_s18 = smov 2  }
   0x8   :  { %46 = dma.hbm_to_vmem [thread:$0]  %s39_s11, 256, %s41_s13, [#allocation6], %s1463_s17, %s1463_s17, %s1464_s18  }
   0x9   :  { %s1465_s19 = smov [#allocation8]   ;;  %s1466_s21 = smov 128  }
   0xa   :  { %s66_s20 = sshll.u32 %s1465_s19, 4  ;;  %s1467_s1 = smov 8   ;;  %s67_s20 = int_to_ptr.vmem [resolvable:$true] %s66_s20 }
   0xb   :  { %72 = dma.hbm_to_vmem [thread:$0]  %s65_s16, 512, %s67_s20, [#allocation9], %s1466_s21, %s1466_s21, %s1467_s1  }
   0xc   :  { %s25_s24 = sshll.u32 %s1763_s0, 4  ;;  %s1468_s25 = smov [#allocation2]   ;;  %s26_s24 = int_to_ptr.hbm [resolvable:$true] %s25_s24 }
   0xd   :  { %s27_s3 = sshll.u32 %s1468_s25, 4  ;;  %s51_s28 = sshll.u32 %s1765_s2, 4  ;;  %s28_s3 = int_to_ptr.vmem [resolvable:$true] %s27_s3  ;;  %s52_s28 = int_to_ptr.hbm [resolvable:$true] %s51_s28 }
   0xe   :  { %33 = dma.hbm_to_vmem [thread:$0]  %s26_s24, 256, %s28_s3, [#allocation3], %s1463_s17, %s1463_s17, %s1464_s18  }
   0xf   :  { %s1469_s29 = smov [#allocation7]   ;;  %s77_s12 = sshll.u32 %s1767_s4, 4  ;;  %s78_s12 = int_to_ptr.hbm [resolvable:$true] %s77_s12 }
  0x10   :  { %s53_s30 = sshll.u32 %s1469_s29, 4  ;;  %s90_s2 = sshll.u32 %s1768_s5, 4  ;;  %s54_s30 = int_to_ptr.vmem [resolvable:$true] %s53_s30  ;;  %s91_s2 = int_to_ptr.hbm [resolvable:$true] %s90_s2 }
  0x11   :  { %59 = dma.hbm_to_vmem [thread:$0]  %s52_s28, 256, %s54_s30, [#allocation6], %s1463_s17, %s1463_s17, %s1464_s18  }
  0x12   :  { %s1470_s14 = smov [#allocation10]   ;;  %s1471_s16 = smov [#allocation11]  }
  0x13   :  { %s79_s15 = sshll.u32 %s1470_s14, 4  ;;  %s92_s19 = sshll.u32 %s1471_s16, 4  ;;  %s80_s15 = int_to_ptr.vmem [resolvable:$true] %s79_s15  ;;  %s93_s19 = int_to_ptr.vmem [resolvable:$true] %s92_s19 }
  0x14   :  { %85 = dma.hbm_to_vmem [thread:$0]  %s78_s12, 512, %s80_s15, [#allocation9], %s1466_s21, %s1466_s21, %s1467_s1  }
  0x15   :  { %98 = dma.hbm_to_vmem [thread:$0]  %s91_s2, 512, %s93_s19, [#allocation12], %s1466_s21, %s1466_s21, %s1467_s1  }
  0x16   :  { %1450 = dma.done.wait [#allocation3], 256  }
  0x17   :  { %1451 = vsyncadd [#allocation3], 4294967040 }
  0x18   :  { %1452 = dma.done.wait [#allocation6], 512  }
  0x19   :  { %1453 = vsyncadd [#allocation6], 4294966784 }
  0x1a   :  { %1454 = dma.done.wait [#allocation9], 1024  }
  0x1b   :  { %1455 = vsyncadd [#allocation9], 4294966272 }
  0x1c   :  { %1456 = dma.done.wait [#allocation12], 512  }
  0x1d   :  { %1457 = vsyncadd [#allocation12], 4294966784  ;;  %v1551_v0 = vld [vmem:[#allocation8 + $0x18] sm:$0xff]  ;;  %v1555_v2 = vld [vmem:[#allocation8 + $0x10] sm:$0xff]  ;;  %vm144_vm0 = vcmask 261120   ;;  %vm258_vm9 = vcmask 254976  }
  0x1e   :  { %v1553_v1 = vld [vmem:[#allocation10 + $0x18] sm:$0xff]  ;;  %160 = vmatpush.msra.mxu0 %v1551_v0  ;;  %v1559_v3 = vld [vmem:[#allocation10 + $0x10] sm:$0xff]  ;;  %v1561_v4 = vld [vmem:[#allocation8 + $0x8] sm:$0xff]  ;;  %281 = vmatpush.msra.mxu3 %v1551_v0  ;;  %s1093_s23 = sshll.u32 %s1771_s8, 4  ;;  %s1473_s24 = smov [#allocation14]   ;;  %s1094_s23 = int_to_ptr.hbm [resolvable:$true] %s1093_s23 }
  0x1f   :  { %180 = vmatpush.msra.mxu1 %v1553_v1  ;;  %v1563_v5 = vld [vmem:[#allocation10 + $0x8] sm:$0xff]  ;;  %v1568_v6 = vld [vmem:[#allocation11 + $0x18] sm:$0xff]  ;;  %v1570_v7 = vld [vmem:[#allocation11 + $0x10] sm:$0xff]  ;;  %s1105_s25 = sshll.u32 %s1473_s24, 4  ;;  %s1107_s27 = sshll.u32 %s1772_s9, 4  ;;  %s1106_s25 = int_to_ptr.vmem [resolvable:$true] %s1105_s25  ;;  %s1108_s27 = int_to_ptr.hbm [resolvable:$true] %s1107_s27 }
  0x20   :  { %161 = vmatpush.msra.mxu0 %v1555_v2  ;;  %v1572_v8 = vld [vmem:[#allocation8] sm:$0xff]  ;;  %203 = vmatpush.msra.mxu2 %v1568_v6  ;;  %v1583_v10 = vld [vmem:[%s1770_s7] sm:$0x3]  ;;  %v1586_v11 = vld [vmem:[#allocation11 + $0x8] sm:$0xff] }
  0x21   :  { %181 = vmatpush.msra.mxu1 %v1559_v3  ;;  %v1574_v9 = vld [vmem:[#allocation10] sm:$0xff]  ;;  %282 = vmatpush.msra.mxu3 %v1555_v2  ;;  %v141_v13 = vld [vmem:[#allocation2] sm:$0x3]  ;;  %v261_v60 = vld [vmem:[#allocation2 + $0x2] sm:$0x3] }
  0x22   :  { %162 = vmatpush.msra.mxu0 %v1561_v4  ;;  %204 = vmatpush.msra.mxu2 %v1570_v7  ;;  %v1595_v12 = vld [vmem:[#allocation11] sm:$0xff]  ;;  %v1633_v29 = vld [vmem:[%s1769_s6] ss:$0 sm:$0xff]  ;;  %s1472_s6 = smov [#allocation13]  }
  0x23   :  { %182 = vmatpush.msra.mxu1 %v1563_v5  ;;  %283 = vmatpush.msra.mxu3 %v1561_v4  ;;  %v142_v14 = vld [vmem:[#allocation5] sm:$0x3]  ;;  %v143_v42 = vld [vmem:[#allocation7] sm:$0x3]  ;;  %v263_v56 = vld [vmem:[#allocation5 + $0x2] sm:$0x3] }
  0x24   :  { %163 = vmatpush.msra.mxu0 %v1572_v8  ;;  %205 = vmatpush.msra.mxu2 %v1586_v11  ;;  %s1091_s21 = sshll.u32 %s1472_s6, 4  ;;  %s1092_s21 = int_to_ptr.vmem [resolvable:$true] %s1091_s21 }
  0x25   :  { %183 = vmatpush.msra.mxu1 %v1574_v9  ;;  %1125 = vmatmul.msk.f32.vlgmr.msra.gmra.mxu0 %vm144_vm0, %v1583_v10 }
  0x26   :  { %1126 = vmatmul.msk.f32.vlgmr.msra.gmra.mxu1 %vm144_vm0, %v1583_v10  ;;  %301 = vmatpush.msrb.mxu0 %v1553_v1 }
  0x27   :  { %321 = vmatpush.msrb.mxu1 %v1568_v6  ;;  %284 = vmatpush.msra.mxu3 %v1572_v8 }
  0x28   :  { %206 = vmatpush.msra.mxu2 %v1595_v12  ;;  %302 = vmatpush.msrb.mxu0 %v1559_v3 }
  0x29   :  { %1127 = vmatmul.msk.f32.vlgmr.msra.gmra.mxu2 %vm144_vm0, %v1583_v10  ;;  %322 = vmatpush.msrb.mxu1 %v1570_v7 }
  0x2a   :  { %303 = vmatpush.msrb.mxu0 %v1563_v5  ;;  %399 = vmatpush.msrb.mxu2 %v1551_v0 }
  0x2b   :  { %323 = vmatpush.msrb.mxu1 %v1586_v11  ;;  %419 = vmatpush.msrb.mxu3 %v1553_v1 }
  0x2c   :  { %304 = vmatpush.msrb.mxu0 %v1574_v9  ;;  %400 = vmatpush.msrb.mxu2 %v1555_v2 }
  0x2d   :  { %324 = vmatpush.msrb.mxu1 %v1595_v12  ;;  %420 = vmatpush.msrb.mxu3 %v1559_v3 }
  0x2e   :  { %439 = vmatpush.msra.mxu0 %v1568_v6  ;;  %401 = vmatpush.msrb.mxu2 %v1561_v4 }
  0x2f   :  { %517 = vmatpush.msra.mxu1 %v1551_v0  ;;  %421 = vmatpush.msrb.mxu3 %v1563_v5 }
  0x30   :  { %440 = vmatpush.msra.mxu0 %v1570_v7  ;;  %402 = vmatpush.msrb.mxu2 %v1572_v8 }
  0x31   :  { %422 = vmatpush.msrb.mxu3 %v1574_v9  ;;  %518 = vmatpush.msra.mxu1 %v1555_v2 }
  0x32   :  { %441 = vmatpush.msra.mxu0 %v1586_v11  ;;  %537 = vmatpush.msra.mxu2 %v1553_v1 }
  0x33   :  { %519 = vmatpush.msra.mxu1 %v1561_v4 }
  0x34   :  { %442 = vmatpush.msra.mxu0 %v1595_v12  ;;  %538 = vmatpush.msra.mxu2 %v1559_v3 }
  0x35   :  { %520 = vmatpush.msra.mxu1 %v1572_v8 }
  0x36   :  { %539 = vmatpush.msra.mxu2 %v1563_v5 }
  0x38   :  { %540 = vmatpush.msra.mxu2 %v1574_v9 }
  0xa2   :  { %v165_v15 = vpop.f32.mrf.mxu0 }
  0xa3   :  { %v185_v16 = vpop.f32.mrf.mxu1  ;;  %v211_v17 = vadd.f32 %v165_v15, %v141_v13 }
  0xa4   :  { %v231_v18 = vadd.f32 %v185_v16, %v142_v14 }
  0xa5   :  { %v1128_v19 = vmul.f32 -1.442695, %v211_v17 }
  0xa6   :  { %v1129_v20 = vmul.f32 -1.442695, %v231_v18 }
  0xa7   :  { %1178 = vpow2.f32 %v1128_v19 }
  0xa8   :  { %1180 = vpow2.f32 %v1129_v20 }
  0xac   :  { %v208_v32 = vpop.f32.mrf.mxu2 }
  0xad   :  { %v1179_v21 = vpop.eup %1178  ;;  %v209_v37 = vadd.f32 %v1633_v29, %v208_v32 }
  0xae   :  { %v1181_v22 = vpop.eup %1180  ;;  %v215_v23 = vadd.f32 1.0, %v1179_v21 }
  0xaf   :  { %v235_v24 = vadd.f32 1.0, %v1181_v22 }
  0xb0   :  { %1182 = vrcp.f32 %v215_v23  ;;  %v227_v33 = vand.u32 2147483648, %v215_v23  ;;  %v225_v35 = vand.u32 2147483647, %v215_v23  ;;  %vm221_vm2 = vweird.f32 %v215_v23 }
  0xb1   :  { %1184 = vrcp.f32 %v235_v24  ;;  %vm241_vm5 = vweird.f32 %v235_v24  ;;  %v247_v44 = vand.u32 2147483648, %v235_v24  ;;  %v245_v46 = vand.u32 2147483647, %v235_v24 }
  0xb2   :  { %v228_v39 = vor.u32 1.1754944e-38, %v227_v33  ;;  %vm226_vm4 = vcmp.eq.f32.partialorder %v225_v35, 8.507059e+37 }
  0xb3   :  { %v248_v49 = vor.u32 1.1754944e-38, %v247_v44  ;;  %vm246_vm8 = vcmp.eq.f32.partialorder %v245_v46, 8.507059e+37 }
  0xb6   :  { %v1183_v25 = vpop.eup %1182 }
  0xb7   :  { %v1185_v26 = vpop.eup %1184  ;;  %v217_v27 = vmul.f32 %v1183_v25, %v215_v23  ;;  %vm222_vm1 = vweird.f32 %v1183_v25 }
  0xb8   :  { %v237_v28 = vmul.f32 %v1185_v26, %v235_v24  ;;  %vm223_vm3 = vmor %vm221_vm2, %vm222_vm1  ;;  %vm242_vm6 = vweird.f32 %v1185_v26 }
  0xb9   :  { %v218_v30 = vsub.f32 1.0, %v217_v27  ;;  %vm243_vm7 = vmor %vm241_vm5, %vm242_vm6 }
  0xba   :  { %v238_v31 = vsub.f32 1.0, %v237_v28 }
  0xbb   :  { %v219_v34 = vmul.f32 %v1183_v25, %v218_v30 }
  0xbc   :  { %v239_v36 = vmul.f32 %v1185_v26, %v238_v31 }
  0xbd   :  { %v220_v38 = vadd.f32 %v1183_v25, %v219_v34  ;;  %v265_v34 = vld [vmem:[#allocation7 + $0x2] sm:$0x3] }
  0xbe   :  { %v240_v41 = vadd.f32 %v1185_v26, %v239_v36 }
  0xbf   :  { %v224_v40 = vsel %vm223_vm3, %v1183_v25, %v220_v38 }
  0xc0   :  { %v229_v43 = vsel %vm226_vm4, %v228_v39, %v224_v40  ;;  %v244_v48 = vsel %vm243_vm7, %v1185_v26, %v240_v41 }
  0xc1   :  { %v251_v45 = vmul.f32 %v229_v43, %v209_v37  ;;  %v249_v50 = vsel %vm246_vm8, %v248_v49, %v244_v48  ;;  %v381_v48 = vld [vmem:[#allocation5 + $0x4] sm:$0x3] }
  0xc2   :  { %v254_v51 = vsub.f32 1.0, %v249_v50  ;;  %v256_v54 = vmul.f32 %v249_v50, %v1583_v10 }
  0xc3   :  { %v252_v47 = vadd.f32 %v251_v45, %v143_v42 }
  0xc5   :  { %1186 = vtanh.f32 %v252_v47  ;;  %v379_v47 = vld [vmem:[#allocation2 + $0x4] sm:$0x3] }
  0xcb   :  { %v1187_v52 = vpop.eup %1186 }
  0xcc   :  { %v255_v53 = vmul.f32 %v1187_v52, %v254_v51 }
  0xce   :  { %v1637_v55 = vadd.f32 %v256_v54, %v255_v53 }
  0xd0   :  { %259 = vst.msk [vmem:[#allocation13] sm:$0x3] %vm258_vm9, %v1637_v55  ;;  %1130 = vmatmul.msk.f32.vlgmr.msra.gmra.mxu3 %vm144_vm0, %v1637_v55  ;;  %1131 = vmatmul.msk.f32.vlgmr.msrb.gmra.mxu0 %vm144_vm0, %v1637_v55 }
  0xd1   :  { %1132 = vmatmul.msk.f32.vlgmr.msrb.gmra.mxu1 %vm144_vm0, %v1637_v55  ;;  %557 = vmatpush.msra.mxu3 %v1568_v6 }
  0xd2   :  { %635 = vmatpush.msrb.mxu0 %v1551_v0  ;;  %655 = vmatpush.msrb.mxu1 %v1553_v1 }
  0xd3   :  { %558 = vmatpush.msra.mxu3 %v1570_v7 }
  0xd4   :  { %636 = vmatpush.msrb.mxu0 %v1555_v2  ;;  %656 = vmatpush.msrb.mxu1 %v1559_v3 }
  0xd5   :  { %559 = vmatpush.msra.mxu3 %v1586_v11 }
  0xd6   :  { %637 = vmatpush.msrb.mxu0 %v1561_v4  ;;  %657 = vmatpush.msrb.mxu1 %v1563_v5 }
  0xd7   :  { %560 = vmatpush.msra.mxu3 %v1595_v12 }
  0xd8   :  { %638 = vmatpush.msrb.mxu0 %v1572_v8  ;;  %658 = vmatpush.msrb.mxu1 %v1574_v9 }
 0x14d   :  { %v306_v57 = vpop.f32.mrf.mxu0 }
 0x14e   :  { %v349_v58 = vadd.f32 %v306_v57, %v263_v56  ;;  %v326_v26 = vpop.f32.mrf.mxu1 }
 0x14f   :  { %v327_v30 = vadd.f32 %v1633_v29, %v326_v26 }
 0x150   :  { %v1134_v59 = vmul.f32 -1.442695, %v349_v58 }
 0x152   :  { %1188 = vpow2.f32 %v1134_v59 }
 0x153   :  { %v286_v61 = vpop.f32.mrf.mxu3 }
 0x154   :  { %v329_v62 = vadd.f32 %v286_v61, %v261_v60 }
 0x156   :  { %v1133_v63 = vmul.f32 -1.442695, %v329_v62 }
 0x158   :  { %v1189_v10 = vpop.eup %1188  ;;  %1190 = vpow2.f32 %v1133_v63 }
 0x159   :  { %v353_v13 = vadd.f32 1.0, %v1189_v10 }
 0x15b   :  { %1192 = vrcp.f32 %v353_v13  ;;  %v365_v35 = vand.u32 2147483648, %v353_v13  ;;  %vm359_vm15 = vweird.f32 %v353_v13  ;;  %v363_v37 = vand.u32 2147483647, %v353_v13 }
 0x15d   :  { %v366_v40 = vor.u32 1.1754944e-38, %v365_v35  ;;  %vm364_vm2 = vcmp.eq.f32.partialorder %v363_v37, 8.507059e+37 }
 0x15e   :  { %v1191_v14 = vpop.eup %1190 }
 0x15f   :  { %v333_v15 = vadd.f32 1.0, %v1191_v14 }
 0x161   :  { %1194 = vrcp.f32 %v333_v15  ;;  %v1193_v16 = vpop.eup %1192  ;;  %v345_v22 = vand.u32 2147483648, %v333_v15  ;;  %v343_v24 = vand.u32 2147483647, %v333_v15  ;;  %vm339_vm11 = vweird.f32 %v333_v15 }
 0x162   :  { %v355_v17 = vmul.f32 %v1193_v16, %v353_v13  ;;  %vm360_vm14 = vweird.f32 %v1193_v16 }
 0x163   :  { %v346_v28 = vor.u32 1.1754944e-38, %v345_v22  ;;  %vm344_vm13 = vcmp.eq.f32.partialorder %v343_v24, 8.507059e+37  ;;  %vm361_vm1 = vmor %vm359_vm15, %vm360_vm14  ;;  %v383_v24 = vld [vmem:[#allocation7 + $0x4] sm:$0x3] }
 0x164   :  { %v356_v20 = vsub.f32 1.0, %v355_v17 }
 0x166   :  { %v357_v25 = vmul.f32 %v1193_v16, %v356_v20 }
 0x167   :  { %v1195_v18 = vpop.eup %1194 }
 0x168   :  { %v335_v19 = vmul.f32 %v1195_v18, %v333_v15  ;;  %vm340_vm10 = vweird.f32 %v1195_v18  ;;  %v358_v32 = vadd.f32 %v1193_v16, %v357_v25 }
 0x169   :  { %vm341_vm12 = vmor %vm339_vm11, %vm340_vm10 }
 0x16a   :  { %v336_v21 = vsub.f32 1.0, %v335_v19  ;;  %v362_v39 = vsel %vm361_vm1, %v1193_v16, %v358_v32 }
 0x16b   :  { %v367_v41 = vsel %vm364_vm2, %v366_v40, %v362_v39 }
 0x16c   :  { %v337_v23 = vmul.f32 %v1195_v18, %v336_v21  ;;  %v372_v42 = vsub.f32 1.0, %v367_v41  ;;  %v374_v45 = vmul.f32 %v367_v41, %v1637_v55 }
 0x16e   :  { %v338_v27 = vadd.f32 %v1195_v18, %v337_v23 }
 0x170   :  { %v342_v31 = vsel %vm341_vm12, %v1195_v18, %v338_v27 }
 0x171   :  { %v347_v33 = vsel %vm344_vm13, %v346_v28, %v342_v31 }
 0x172   :  { %v369_v36 = vmul.f32 %v347_v33, %v327_v30 }
 0x174   :  { %v370_v38 = vadd.f32 %v369_v36, %v265_v34 }
 0x176   :  { %1196 = vtanh.f32 %v370_v38  ;;  %v497_v38 = vld [vmem:[#allocation2 + $0x6] sm:$0x3] }
 0x17c   :  { %v1197_v43 = vpop.eup %1196 }
 0x17d   :  { %v373_v44 = vmul.f32 %v1197_v43, %v372_v42  ;;  %v499_v42 = vld [vmem:[#allocation5 + $0x6] sm:$0x3] }
 0x17f   :  { %v1661_v46 = vadd.f32 %v374_v45, %v373_v44 }
 0x181   :  { %377 = vst.msk [vmem:[#allocation13 + $0x2] sm:$0x3] %vm258_vm9, %v1661_v46  ;;  %1135 = vmatmul.msk.f32.vlgmr.msrb.gmra.mxu2 %vm144_vm0, %v1661_v46  ;;  %1136 = vmatmul.msk.f32.vlgmr.msrb.gmra.mxu3 %vm144_vm0, %v1661_v46 }
 0x182   :  { %1137 = vmatmul.msk.f32.vlgmr.msra.gmra.mxu0 %vm144_vm0, %v1661_v46  ;;  %675 = vmatpush.msrb.mxu2 %v1568_v6 }
 0x183   :  { %753 = vmatpush.msrb.mxu3 %v1551_v0  ;;  %773 = vmatpush.msra.mxu0 %v1553_v1 }
 0x184   :  { %676 = vmatpush.msrb.mxu2 %v1570_v7 }
 0x185   :  { %754 = vmatpush.msrb.mxu3 %v1555_v2  ;;  %774 = vmatpush.msra.mxu0 %v1559_v3 }
 0x186   :  { %677 = vmatpush.msrb.mxu2 %v1586_v11 }
 0x187   :  { %755 = vmatpush.msrb.mxu3 %v1561_v4  ;;  %775 = vmatpush.msra.mxu0 %v1563_v5 }
 0x188   :  { %678 = vmatpush.msrb.mxu2 %v1595_v12 }
 0x189   :  { %756 = vmatpush.msrb.mxu3 %v1572_v8  ;;  %776 = vmatpush.msra.mxu0 %v1574_v9 }
 0x1ff   :  { %v444_v16 = vpop.f32.mrf.mxu0 }
 0x200   :  { %v445_v20 = vadd.f32 %v1633_v29, %v444_v16 }
 0x204   :  { %v404_v49 = vpop.f32.mrf.mxu2  ;;  %v424_v50 = vpop.f32.mrf.mxu3 }
 0x205   :  { %v447_v51 = vadd.f32 %v404_v49, %v379_v47  ;;  %v467_v52 = vadd.f32 %v424_v50, %v381_v48 }
 0x207   :  { %v1138_v53 = vmul.f32 -1.442695, %v447_v51  ;;  %v1139_v54 = vmul.f32 -1.442695, %v467_v52 }
 0x209   :  { %1198 = vpow2.f32 %v1138_v53 }
 0x20a   :  { %1200 = vpow2.f32 %v1139_v54 }
 0x20f   :  { %v1199_v55 = vpop.eup %1198 }
 0x210   :  { %v1201_v56 = vpop.eup %1200  ;;  %v451_v57 = vadd.f32 1.0, %v1199_v55 }
 0x211   :  { %v471_v58 = vadd.f32 1.0, %v1201_v56 }
 0x212   :  { %1202 = vrcp.f32 %v451_v57  ;;  %v463_v10 = vand.u32 2147483648, %v451_v57  ;;  %v461_v15 = vand.u32 2147483647, %v451_v57  ;;  %vm457_vm4 = vweird.f32 %v451_v57 }
 0x213   :  { %1204 = vrcp.f32 %v471_v58  ;;  %v483_v26 = vand.u32 2147483648, %v471_v58  ;;  %vm477_vm8 = vweird.f32 %v471_v58  ;;  %v481_v27 = vand.u32 2147483647, %v471_v58 }
 0x214   :  { %v464_v19 = vor.u32 1.1754944e-38, %v463_v10  ;;  %vm462_vm6 = vcmp.eq.f32.partialorder %v461_v15, 8.507059e+37  ;;  %v501_v10 = vld [vmem:[#allocation7 + $0x6] sm:$0x3] }
 0x215   :  { %v484_v31 = vor.u32 1.1754944e-38, %v483_v26  ;;  %vm482_vm11 = vcmp.eq.f32.partialorder %v481_v27, 8.507059e+37 }
 0x218   :  { %v1203_v59 = vpop.eup %1202 }
 0x219   :  { %v1205_v60 = vpop.eup %1204  ;;  %v453_v61 = vmul.f32 %v1203_v59, %v451_v57  ;;  %vm458_vm3 = vweird.f32 %v1203_v59 }
 0x21a   :  { %v473_v62 = vmul.f32 %v1205_v60, %v471_v58  ;;  %vm459_vm5 = vmor %vm457_vm4, %vm458_vm3  ;;  %vm478_vm7 = vweird.f32 %v1205_v60 }
 0x21b   :  { %v454_v63 = vsub.f32 1.0, %v453_v61  ;;  %vm479_vm10 = vmor %vm477_vm8, %vm478_vm7 }
 0x21c   :  { %v474_v13 = vsub.f32 1.0, %v473_v62 }
 0x21d   :  { %v455_v14 = vmul.f32 %v1203_v59, %v454_v63 }
 0x21e   :  { %v475_v17 = vmul.f32 %v1205_v60, %v474_v13 }
 0x21f   :  { %v456_v18 = vadd.f32 %v1203_v59, %v455_v14 }
 0x220   :  { %v476_v23 = vadd.f32 %v1205_v60, %v475_v17 }
 0x221   :  { %v460_v21 = vsel %vm459_vm5, %v1203_v59, %v456_v18 }
 0x222   :  { %v465_v22 = vsel %vm462_vm6, %v464_v19, %v460_v21  ;;  %v480_v30 = vsel %vm479_vm10, %v1205_v60, %v476_v23 }
 0x223   :  { %v487_v25 = vmul.f32 %v465_v22, %v445_v20  ;;  %v485_v32 = vsel %vm482_vm11, %v484_v31, %v480_v30 }
 0x224   :  { %v490_v33 = vsub.f32 1.0, %v485_v32  ;;  %v492_v36 = vmul.f32 %v485_v32, %v1661_v46 }
 0x225   :  { %v488_v28 = vadd.f32 %v487_v25, %v383_v24 }
 0x227   :  { %1206 = vtanh.f32 %v488_v28 }
 0x22d   :  { %v1207_v34 = vpop.eup %1206 }
 0x22e   :  { %v491_v35 = vmul.f32 %v1207_v34, %v490_v33 }
 0x230   :  { %v1685_v37 = vadd.f32 %v492_v36, %v491_v35 }
 0x232   :  { %495 = vst.msk [vmem:[#allocation13 + $0x4] sm:$0x3] %vm258_vm9, %v1685_v37  ;;  %1140 = vmatmul.msk.f32.vlgmr.msra.gmra.mxu1 %vm144_vm0, %v1685_v37  ;;  %1141 = vmatmul.msk.f32.vlgmr.msra.gmra.mxu2 %vm144_vm0, %v1685_v37 }
 0x233   :  { %1142 = vmatmul.msk.f32.vlgmr.msra.gmra.mxu3 %vm144_vm0, %v1685_v37  ;;  %793 = vmatpush.msra.mxu1 %v1568_v6 }
 0x234   :  { %871 = vmatpush.msra.mxu2 %v1551_v0  ;;  %891 = vmatpush.msra.mxu3 %v1553_v1 }
 0x235   :  { %794 = vmatpush.msra.mxu1 %v1570_v7 }
 0x236   :  { %872 = vmatpush.msra.mxu2 %v1555_v2  ;;  %892 = vmatpush.msra.mxu3 %v1559_v3 }
 0x237   :  { %795 = vmatpush.msra.mxu1 %v1586_v11 }
 0x238   :  { %873 = vmatpush.msra.mxu2 %v1561_v4  ;;  %893 = vmatpush.msra.mxu3 %v1563_v5 }
 0x239   :  { %796 = vmatpush.msra.mxu1 %v1595_v12 }
 0x23a   :  { %874 = vmatpush.msra.mxu2 %v1572_v8  ;;  %894 = vmatpush.msra.mxu3 %v1574_v9 }
 0x2af   :  { %v522_v39 = vpop.f32.mrf.mxu1 }
 0x2b0   :  { %v565_v40 = vadd.f32 %v522_v39, %v497_v38 }
 0x2b2   :  { %v1143_v41 = vmul.f32 -1.442695, %v565_v40 }
 0x2b4   :  { %1208 = vpow2.f32 %v1143_v41 }
 0x2b5   :  { %v542_v43 = vpop.f32.mrf.mxu2 }
 0x2b6   :  { %v585_v44 = vadd.f32 %v542_v43, %v499_v42  ;;  %v562_v57 = vpop.f32.mrf.mxu3 }
 0x2b7   :  { %v563_v62 = vadd.f32 %v1633_v29, %v562_v57 }
 0x2b8   :  { %v1144_v45 = vmul.f32 -1.442695, %v585_v44 }
 0x2ba   :  { %v1209_v46 = vpop.eup %1208  ;;  %1210 = vpow2.f32 %v1144_v45 }
 0x2bb   :  { %v569_v47 = vadd.f32 1.0, %v1209_v46 }
 0x2bd   :  { %1212 = vrcp.f32 %v569_v47  ;;  %v581_v53 = vand.u32 2147483648, %v569_v47  ;;  %v579_v55 = vand.u32 2147483647, %v569_v47  ;;  %vm575_vm13 = vweird.f32 %v569_v47 }
 0x2bf   :  { %v582_v60 = vor.u32 1.1754944e-38, %v581_v53  ;;  %vm580_vm15 = vcmp.eq.f32.partialorder %v579_v55, 8.507059e+37 }
 0x2c0   :  { %v1211_v48 = vpop.eup %1210 }
 0x2c1   :  { %v589_v49 = vadd.f32 1.0, %v1211_v48 }
 0x2c3   :  { %v1213_v50 = vpop.eup %1212  ;;  %1214 = vrcp.f32 %v589_v49  ;;  %v601_v15 = vand.u32 2147483648, %v589_v49  ;;  %v599_v17 = vand.u32 2147483647, %v589_v49  ;;  %vm595_vm2 = vweird.f32 %v589_v49 }
 0x2c4   :  { %v571_v51 = vmul.f32 %v1213_v50, %v569_v47  ;;  %vm576_vm12 = vweird.f32 %v1213_v50 }
 0x2c5   :  { %vm577_vm14 = vmor %vm575_vm13, %vm576_vm12  ;;  %v602_v20 = vor.u32 1.1754944e-38, %v601_v15  ;;  %vm600_vm4 = vcmp.eq.f32.partialorder %v599_v17, 8.507059e+37  ;;  %v733_v15 = vld [vmem:[#allocation2 + $0xa] sm:$0x3] }
 0x2c6   :  { %v572_v52 = vsub.f32 1.0, %v571_v51 }
 0x2c8   :  { %v573_v54 = vmul.f32 %v1213_v50, %v572_v52 }
 0x2c9   :  { %v1215_v56 = vpop.eup %1214 }
 0x2ca   :  { %v591_v58 = vmul.f32 %v1215_v56, %v589_v49  ;;  %v574_v59 = vadd.f32 %v1213_v50, %v573_v54  ;;  %vm596_vm1 = vweird.f32 %v1215_v56  ;;  %v619_v49 = vld [vmem:[#allocation7 + $0x8] sm:$0x3] }
 0x2cb   :  { %vm597_vm3 = vmor %vm595_vm2, %vm596_vm1 }
 0x2cc   :  { %v592_v61 = vsub.f32 1.0, %v591_v58  ;;  %v578_v63 = vsel %vm577_vm14, %v1213_v50, %v574_v59 }
 0x2cd   :  { %v583_v13 = vsel %vm580_vm15, %v582_v60, %v578_v63  ;;  %v735_v63 = vld [vmem:[#allocation5 + $0xa] sm:$0x3] }
 0x2ce   :  { %v593_v14 = vmul.f32 %v1215_v56, %v592_v61  ;;  %v605_v16 = vmul.f32 %v583_v13, %v563_v62 }
 0x2d0   :  { %v594_v18 = vadd.f32 %v1215_v56, %v593_v14  ;;  %v606_v19 = vadd.f32 %v605_v16, %v501_v10 }
 0x2d2   :  { %v598_v21 = vsel %vm597_vm3, %v1215_v56, %v594_v18  ;;  %1216 = vtanh.f32 %v606_v19 }
 0x2d3   :  { %v603_v22 = vsel %vm600_vm4, %v602_v20, %v598_v21 }
 0x2d4   :  { %v608_v23 = vsub.f32 1.0, %v603_v22  ;;  %v610_v26 = vmul.f32 %v603_v22, %v1685_v37 }
 0x2d8   :  { %v1217_v24 = vpop.eup %1216 }
 0x2d9   :  { %v609_v25 = vmul.f32 %v1217_v24, %v608_v23 }
 0x2db   :  { %v1709_v27 = vadd.f32 %v610_v26, %v609_v25 }
 0x2dd   :  { %613 = vst.msk [vmem:[#allocation13 + $0x6] sm:$0x3] %vm258_vm9, %v1709_v27  ;;  %1145 = vmatmul.msk.f32.vlgmr.msrb.gmra.mxu0 %vm144_vm0, %v1709_v27  ;;  %1146 = vmatmul.msk.f32.vlgmr.msrb.gmra.mxu1 %vm144_vm0, %v1709_v27 }
 0x2de   :  { %1147 = vmatmul.msk.f32.vlgmr.msrb.gmra.mxu2 %vm144_vm0, %v1709_v27  ;;  %911 = vmatpush.msrb.mxu0 %v1568_v6 }
 0x2df   :  { %989 = vmatpush.msrb.mxu1 %v1551_v0  ;;  %1009 = vmatpush.msrb.mxu2 %v1553_v1  ;;  %v615_v0 = vld [vmem:[#allocation2 + $0x8] sm:$0x3]  ;;  %v617_v1 = vld [vmem:[#allocation5 + $0x8] sm:$0x3] }
 0x2e0   :  { %912 = vmatpush.msrb.mxu0 %v1570_v7 }
 0x2e1   :  { %990 = vmatpush.msrb.mxu1 %v1555_v2  ;;  %1010 = vmatpush.msrb.mxu2 %v1559_v3 }
 0x2e2   :  { %913 = vmatpush.msrb.mxu0 %v1586_v11 }
 0x2e3   :  { %991 = vmatpush.msrb.mxu1 %v1561_v4  ;;  %1011 = vmatpush.msrb.mxu2 %v1563_v5 }
 0x2e4   :  { %914 = vmatpush.msrb.mxu0 %v1595_v12 }
 0x2e5   :  { %992 = vmatpush.msrb.mxu1 %v1572_v8  ;;  %1012 = vmatpush.msrb.mxu2 %v1574_v9 }
 0x35a   :  { %v640_v28 = vpop.f32.mrf.mxu0  ;;  %v660_v30 = vpop.f32.mrf.mxu1 }
 0x35b   :  { %v683_v31 = vadd.f32 %v640_v28, %v615_v0  ;;  %v703_v2 = vadd.f32 %v660_v30, %v617_v1 }
 0x35d   :  { %v1148_v32 = vmul.f32 -1.442695, %v683_v31  ;;  %v1149_v3 = vmul.f32 -1.442695, %v703_v2 }
 0x35f   :  { %1218 = vpow2.f32 %v1148_v32 }
 0x360   :  { %1220 = vpow2.f32 %v1149_v3 }
 0x361   :  { %v680_v43 = vpop.f32.mrf.mxu2 }
 0x362   :  { %v681_v46 = vadd.f32 %v1633_v29, %v680_v43  ;;  %v853_v43 = vld [vmem:[#allocation5 + $0xc] sm:$0x3] }
 0x365   :  { %v1219_v33 = vpop.eup %1218 }
 0x366   :  { %v1221_v4 = vpop.eup %1220  ;;  %v687_v34 = vadd.f32 1.0, %v1219_v33  ;;  %v737_v33 = vld [vmem:[#allocation7 + $0xa] sm:$0x3] }
 0x367   :  { %v707_v5 = vadd.f32 1.0, %v1221_v4 }
 0x368   :  { %1222 = vrcp.f32 %v687_v34  ;;  %v699_v39 = vand.u32 2147483648, %v687_v34  ;;  %v697_v41 = vand.u32 2147483647, %v687_v34  ;;  %vm693_vm6 = vweird.f32 %v687_v34 }
 0x369   :  { %1224 = vrcp.f32 %v707_v5  ;;  %v719_v51 = vand.u32 2147483648, %v707_v5  ;;  %vm713_vm11 = vweird.f32 %v707_v5  ;;  %v717_v53 = vand.u32 2147483647, %v707_v5 }
 0x36a   :  { %v700_v45 = vor.u32 1.1754944e-38, %v699_v39  ;;  %vm698_vm8 = vcmp.eq.f32.partialorder %v697_v41, 8.507059e+37 }
 0x36b   :  { %v720_v56 = vor.u32 1.1754944e-38, %v719_v51  ;;  %vm718_vm13 = vcmp.eq.f32.partialorder %v717_v53, 8.507059e+37 }
 0x36e   :  { %v1223_v35 = vpop.eup %1222 }
 0x36f   :  { %v1225_v8 = vpop.eup %1224  ;;  %v689_v36 = vmul.f32 %v1223_v35, %v687_v34  ;;  %vm694_vm5 = vweird.f32 %v1223_v35 }
 0x370   :  { %v709_v9 = vmul.f32 %v1225_v8, %v707_v5  ;;  %vm695_vm7 = vmor %vm693_vm6, %vm694_vm5  ;;  %vm714_vm10 = vweird.f32 %v1225_v8 }
 0x371   :  { %v690_v37 = vsub.f32 1.0, %v689_v36  ;;  %vm715_vm12 = vmor %vm713_vm11, %vm714_vm10 }
 0x372   :  { %v710_v38 = vsub.f32 1.0, %v709_v9 }
 0x373   :  { %v691_v40 = vmul.f32 %v1223_v35, %v690_v37 }
 0x374   :  { %v711_v42 = vmul.f32 %v1225_v8, %v710_v38 }
 0x375   :  { %v692_v44 = vadd.f32 %v1223_v35, %v691_v40 }
 0x376   :  { %v712_v48 = vadd.f32 %v1225_v8, %v711_v42  ;;  %v851_v42 = vld [vmem:[#allocation2 + $0xc] sm:$0x3] }
 0x377   :  { %v696_v47 = vsel %vm695_vm7, %v1223_v35, %v692_v44 }
 0x378   :  { %v701_v50 = vsel %vm698_vm8, %v700_v45, %v696_v47  ;;  %v716_v55 = vsel %vm715_vm12, %v1225_v8, %v712_v48 }
 0x379   :  { %v723_v52 = vmul.f32 %v701_v50, %v681_v46  ;;  %v721_v57 = vsel %vm718_vm13, %v720_v56, %v716_v55 }
 0x37a   :  { %v726_v58 = vsub.f32 1.0, %v721_v57  ;;  %v728_v61 = vmul.f32 %v721_v57, %v1709_v27 }
 0x37b   :  { %v724_v54 = vadd.f32 %v723_v52, %v619_v49 }
 0x37d   :  { %1226 = vtanh.f32 %v724_v54 }
 0x383   :  { %v1227_v59 = vpop.eup %1226 }
 0x384   :  { %v727_v60 = vmul.f32 %v1227_v59, %v726_v58 }
 0x386   :  { %v729_v62 = vadd.f32 %v728_v61, %v727_v60 }
 0x388   :  { %731 = vst.msk [vmem:[#allocation13 + $0x8] sm:$0x3] %vm258_vm9, %v729_v62  ;;  %1150 = vmatmul.msk.f32.vlgmr.msrb.gmra.mxu3 %vm144_vm0, %v729_v62  ;;  %1151 = vmatmul.msk.f32.vlgmr.msra.gmra.mxu0 %vm144_vm0, %v729_v62 }
 0x389   :  { %1152 = vmatmul.msk.f32.vlgmr.msra.gmra.mxu1 %vm144_vm0, %v729_v62  ;;  %1029 = vmatpush.msrb.mxu3 %v1568_v6 }
 0x38b   :  { %1030 = vmatpush.msrb.mxu3 %v1570_v7 }
 0x38d   :  { %1031 = vmatpush.msrb.mxu3 %v1586_v11 }
 0x38f   :  { %1032 = vmatpush.msrb.mxu3 %v1595_v12 }
 0x405   :  { %v778_v10 = vpop.f32.mrf.mxu0 }
 0x406   :  { %v821_v13 = vadd.f32 %v778_v10, %v735_v63  ;;  %v798_v1 = vpop.f32.mrf.mxu1 }
 0x407   :  { %v799_v31 = vadd.f32 %v1633_v29, %v798_v1 }
 0x408   :  { %v1154_v14 = vmul.f32 -1.442695, %v821_v13 }
 0x40a   :  { %1228 = vpow2.f32 %v1154_v14 }
 0x40b   :  { %v758_v16 = vpop.f32.mrf.mxu3 }
 0x40c   :  { %v801_v17 = vadd.f32 %v758_v16, %v733_v15 }
 0x40e   :  { %v1153_v18 = vmul.f32 -1.442695, %v801_v17 }
 0x410   :  { %v1229_v19 = vpop.eup %1228  ;;  %1230 = vpow2.f32 %v1153_v18 }
 0x411   :  { %v825_v20 = vadd.f32 1.0, %v1229_v19  ;;  %v855_v19 = vld [vmem:[#allocation7 + $0xc] sm:$0x3] }
 0x413   :  { %1232 = vrcp.f32 %v825_v20  ;;  %v837_v4 = vand.u32 2147483648, %v825_v20  ;;  %vm831_vm4 = vweird.f32 %v825_v20  ;;  %v835_v5 = vand.u32 2147483647, %v825_v20 }
 0x415   :  { %v838_v36 = vor.u32 1.1754944e-38, %v837_v4  ;;  %vm836_vm6 = vcmp.eq.f32.partialorder %v835_v5, 8.507059e+37 }
 0x416   :  { %v1231_v6 = vpop.eup %1230 }
 0x417   :  { %v805_v21 = vadd.f32 1.0, %v1231_v6 }
 0x419   :  { %1234 = vrcp.f32 %v805_v21  ;;  %v1233_v7 = vpop.eup %1232  ;;  %v817_v25 = vand.u32 2147483648, %v805_v21  ;;  %v815_v27 = vand.u32 2147483647, %v805_v21  ;;  %vm811_vm15 = vweird.f32 %v805_v21 }
 0x41a   :  { %v827_v11 = vmul.f32 %v1233_v7, %v825_v20  ;;  %vm832_vm3 = vweird.f32 %v1233_v7 }
 0x41b   :  { %v818_v30 = vor.u32 1.1754944e-38, %v817_v25  ;;  %vm816_vm2 = vcmp.eq.f32.partialorder %v815_v27, 8.507059e+37  ;;  %vm833_vm5 = vmor %vm831_vm4, %vm832_vm3 }
 0x41c   :  { %v828_v23 = vsub.f32 1.0, %v827_v11 }
 0x41e   :  { %v829_v0 = vmul.f32 %v1233_v7, %v828_v23 }
 0x41f   :  { %v1235_v22 = vpop.eup %1234 }
 0x420   :  { %v807_v12 = vmul.f32 %v1235_v22, %v805_v21  ;;  %vm812_vm14 = vweird.f32 %v1235_v22  ;;  %v830_v32 = vadd.f32 %v1233_v7, %v829_v0  ;;  %v969_v0 = vld [vmem:[#allocation2 + $0xe] sm:$0x3] }
 0x421   :  { %vm813_vm1 = vmor %vm811_vm15, %vm812_vm14 }
 0x422   :  { %v808_v24 = vsub.f32 1.0, %v807_v12  ;;  %v834_v8 = vsel %vm833_vm5, %v1233_v7, %v830_v32 }
 0x423   :  { %v839_v9 = vsel %vm836_vm6, %v838_v36, %v834_v8 }
 0x424   :  { %v809_v26 = vmul.f32 %v1235_v22, %v808_v24  ;;  %v844_v37 = vsub.f32 1.0, %v839_v9  ;;  %v846_v40 = vmul.f32 %v839_v9, %v729_v62 }
 0x426   :  { %v810_v28 = vadd.f32 %v1235_v22, %v809_v26 }
 0x428   :  { %v814_v2 = vsel %vm813_vm1, %v1235_v22, %v810_v28 }
 0x429   :  { %v819_v3 = vsel %vm816_vm2, %v818_v30, %v814_v2 }
 0x42a   :  { %v841_v34 = vmul.f32 %v819_v3, %v799_v31  ;;  %v971_v31 = vld [vmem:[#allocation5 + $0xe] sm:$0x3] }
 0x42c   :  { %v842_v35 = vadd.f32 %v841_v34, %v737_v33 }
 0x42e   :  { %1236 = vtanh.f32 %v842_v35 }
 0x434   :  { %v1237_v38 = vpop.eup %1236 }
 0x435   :  { %v845_v39 = vmul.f32 %v1237_v38, %v844_v37 }
 0x437   :  { %v847_v41 = vadd.f32 %v846_v40, %v845_v39 }
 0x439   :  { %849 = vst.msk [vmem:[#allocation13 + $0xa] sm:$0x3] %vm258_vm9, %v847_v41  ;;  %1155 = vmatmul.msk.f32.vlgmr.msra.gmra.mxu2 %vm144_vm0, %v847_v41  ;;  %1156 = vmatmul.msk.f32.vlgmr.msra.gmra.mxu3 %vm144_vm0, %v847_v41 }
 0x43a   :  { %1157 = vmatmul.msk.f32.vlgmr.msrb.gmra.mxu0 %vm144_vm0, %v847_v41 }
 0x4b7   :  { %v916_v63 = vpop.f32.mrf.mxu0 }
 0x4b8   :  { %v917_v15 = vadd.f32 %v1633_v29, %v916_v63 }
 0x4bc   :  { %v876_v44 = vpop.f32.mrf.mxu2  ;;  %v896_v45 = vpop.f32.mrf.mxu3 }
 0x4bd   :  { %v919_v46 = vadd.f32 %v876_v44, %v851_v42  ;;  %v939_v47 = vadd.f32 %v896_v45, %v853_v43 }
 0x4bf   :  { %v1158_v48 = vmul.f32 -1.442695, %v919_v46  ;;  %v1159_v49 = vmul.f32 -1.442695, %v939_v47  ;;  %v973_v47 = vld [vmem:[#allocation7 + $0xe] sm:$0x3] }
 0x4c1   :  { %1238 = vpow2.f32 %v1158_v48 }
 0x4c2   :  { %1240 = vpow2.f32 %v1159_v49 }
 0x4c7   :  { %v1239_v50 = vpop.eup %1238 }
 0x4c8   :  { %v1241_v51 = vpop.eup %1240  ;;  %v923_v52 = vadd.f32 1.0, %v1239_v50 }
 0x4c9   :  { %v943_v53 = vadd.f32 1.0, %v1241_v51 }
 0x4ca   :  { %1242 = vrcp.f32 %v923_v52  ;;  %v935_v59 = vand.u32 2147483648, %v923_v52  ;;  %v933_v62 = vand.u32 2147483647, %v923_v52  ;;  %vm929_vm8 = vweird.f32 %v923_v52 }
 0x4cb   :  { %1244 = vrcp.f32 %v943_v53  ;;  %v955_v6 = vand.u32 2147483648, %v943_v53  ;;  %vm949_vm13 = vweird.f32 %v943_v53  ;;  %v953_v21 = vand.u32 2147483647, %v943_v53 }
 0x4cc   :  { %v936_v14 = vor.u32 1.1754944e-38, %v935_v59  ;;  %vm934_vm11 = vcmp.eq.f32.partialorder %v933_v62, 8.507059e+37 }
 0x4cd   :  { %v956_v22 = vor.u32 1.1754944e-38, %v955_v6  ;;  %vm954_vm15 = vcmp.eq.f32.partialorder %v953_v21, 8.507059e+37 }
 0x4d0   :  { %v1243_v54 = vpop.eup %1242 }
 0x4d1   :  { %v1245_v55 = vpop.eup %1244  ;;  %v925_v56 = vmul.f32 %v1243_v54, %v923_v52  ;;  %vm930_vm7 = vweird.f32 %v1243_v54 }
 0x4d2   :  { %v945_v57 = vmul.f32 %v1245_v55, %v943_v53  ;;  %vm931_vm10 = vmor %vm929_vm8, %vm930_vm7  ;;  %vm950_vm12 = vweird.f32 %v1245_v55 }
 0x4d3   :  { %v926_v58 = vsub.f32 1.0, %v925_v56  ;;  %vm951_vm14 = vmor %vm949_vm13, %vm950_vm12 }
 0x4d4   :  { %v946_v60 = vsub.f32 1.0, %v945_v57 }
 0x4d5   :  { %v927_v61 = vmul.f32 %v1243_v54, %v926_v58 }
 0x4d6   :  { %v947_v10 = vmul.f32 %v1245_v55, %v946_v60 }
 0x4d7   :  { %v928_v13 = vadd.f32 %v1243_v54, %v927_v61 }
 0x4d8   :  { %v948_v18 = vadd.f32 %v1245_v55, %v947_v10 }
 0x4d9   :  { %v932_v16 = vsel %vm931_vm10, %v1243_v54, %v928_v13 }
 0x4da   :  { %v937_v17 = vsel %vm934_vm11, %v936_v14, %v932_v16  ;;  %v952_v11 = vsel %vm951_vm14, %v1245_v55, %v948_v18 }
 0x4db   :  { %v959_v20 = vmul.f32 %v937_v17, %v917_v15  ;;  %v957_v12 = vsel %vm954_vm15, %v956_v22, %v952_v11 }
 0x4dc   :  { %v962_v23 = vsub.f32 1.0, %v957_v12  ;;  %v964_v26 = vmul.f32 %v957_v12, %v847_v41 }
 0x4dd   :  { %v960_v7 = vadd.f32 %v959_v20, %v855_v19 }
 0x4df   :  { %1246 = vtanh.f32 %v960_v7 }
 0x4e5   :  { %v1247_v24 = vpop.eup %1246 }
 0x4e6   :  { %v963_v25 = vmul.f32 %v1247_v24, %v962_v23 }
 0x4e8   :  { %v965_v27 = vadd.f32 %v964_v26, %v963_v25 }
 0x4ea   :  { %967 = vst.msk [vmem:[#allocation13 + $0xc] sm:$0x3] %vm258_vm9, %v965_v27  ;;  %1160 = vmatmul.msk.f32.vlgmr.msrb.gmra.mxu1 %vm144_vm0, %v965_v27  ;;  %1161 = vmatmul.msk.f32.vlgmr.msrb.gmra.mxu2 %vm144_vm0, %v965_v27 }
 0x4eb   :  { %1162 = vmatmul.msk.f32.vlgmr.msrb.gmra.mxu3 %vm144_vm0, %v965_v27 }
 0x567   :  { %v994_v1 = vpop.f32.mrf.mxu1 }
 0x568   :  { %v1037_v28 = vadd.f32 %v994_v1, %v969_v0 }
 0x56a   :  { %v1163_v30 = vmul.f32 -1.442695, %v1037_v28 }
 0x56c   :  { %1248 = vpow2.f32 %v1163_v30 }
 0x56d   :  { %v1014_v2 = vpop.f32.mrf.mxu2 }
 0x56e   :  { %v1057_v32 = vadd.f32 %v1014_v2, %v971_v31  ;;  %v1034_v40 = vpop.f32.mrf.mxu3 }
 0x56f   :  { %v1035_v45 = vadd.f32 %v1633_v29, %v1034_v40 }
 0x570   :  { %v1164_v3 = vmul.f32 -1.442695, %v1057_v32 }
 0x572   :  { %v1249_v33 = vpop.eup %1248  ;;  %1250 = vpow2.f32 %v1164_v3 }
 0x573   :  { %v1041_v4 = vadd.f32 1.0, %v1249_v33 }
 0x575   :  { %1252 = vrcp.f32 %v1041_v4  ;;  %v1053_v9 = vand.u32 2147483648, %v1041_v4  ;;  %v1051_v38 = vand.u32 2147483647, %v1041_v4  ;;  %vm1047_vm1 = vweird.f32 %v1041_v4 }
 0x577   :  { %v1054_v43 = vor.u32 1.1754944e-38, %v1053_v9  ;;  %vm1052_vm3 = vcmp.eq.f32.partialorder %v1051_v38, 8.507059e+37 }
 0x578   :  { %v1251_v34 = vpop.eup %1250 }
 0x579   :  { %v1061_v5 = vadd.f32 1.0, %v1251_v34 }
 0x57b   :  { %v1253_v35 = vpop.eup %1252  ;;  %1254 = vrcp.f32 %v1061_v5  ;;  %v1073_v50 = vand.u32 2147483648, %v1061_v5  ;;  %v1071_v52 = vand.u32 2147483647, %v1061_v5  ;;  %vm1067_vm5 = vweird.f32 %v1061_v5 }
 0x57c   :  { %v1043_v8 = vmul.f32 %v1253_v35, %v1041_v4  ;;  %vm1048_vm0 = vweird.f32 %v1253_v35 }
 0x57d   :  { %vm1049_vm2 = vmor %vm1047_vm1, %vm1048_vm0  ;;  %v1074_v55 = vor.u32 1.1754944e-38, %v1073_v50  ;;  %vm1072_vm7 = vcmp.eq.f32.partialorder %v1071_v52, 8.507059e+37 }
 0x57e   :  { %v1044_v36 = vsub.f32 1.0, %v1043_v8 }
 0x580   :  { %v1045_v37 = vmul.f32 %v1253_v35, %v1044_v36 }
 0x581   :  { %v1255_v39 = vpop.eup %1254 }
 0x582   :  { %v1063_v41 = vmul.f32 %v1255_v39, %v1061_v5  ;;  %v1046_v42 = vadd.f32 %v1253_v35, %v1045_v37  ;;  %vm1068_vm4 = vweird.f32 %v1255_v39 }
 0x583   :  { %vm1069_vm6 = vmor %vm1067_vm5, %vm1068_vm4 }
 0x584   :  { %v1064_v44 = vsub.f32 1.0, %v1063_v41  ;;  %v1050_v46 = vsel %vm1049_vm2, %v1253_v35, %v1046_v42 }
 0x585   :  { %v1055_v48 = vsel %vm1052_vm3, %v1054_v43, %v1050_v46 }
 0x586   :  { %v1065_v49 = vmul.f32 %v1255_v39, %v1064_v44  ;;  %v1077_v51 = vmul.f32 %v1055_v48, %v1035_v45 }
 0x588   :  { %v1066_v53 = vadd.f32 %v1255_v39, %v1065_v49  ;;  %v1078_v54 = vadd.f32 %v1077_v51, %v973_v47 }
 0x58a   :  { %v1070_v56 = vsel %vm1069_vm6, %v1255_v39, %v1066_v53  ;;  %1256 = vtanh.f32 %v1078_v54 }
 0x58b   :  { %v1075_v57 = vsel %vm1072_vm7, %v1074_v55, %v1070_v56 }
 0x58c   :  { %v1080_v58 = vsub.f32 1.0, %v1075_v57  ;;  %v1082_v60 = vmul.f32 %v1075_v57, %v965_v27 }
 0x590   :  { %v1257_v29 = vpop.eup %1256 }
 0x591   :  { %v1081_v59 = vmul.f32 %v1257_v29, %v1080_v58 }
 0x593   :  { %v1083_v61 = vadd.f32 %v1082_v60, %v1081_v59 }
 0x595   :  { %1085 = vst.msk [vmem:[#allocation13 + $0xe] sm:$0x3] %vm258_vm9, %v1083_v61 }
 0x596   :  { %1086 = vst.msk [vmem:[#allocation14] sm:$0x3] %vm258_vm9, %v1083_v61  ;;  %1099 = dma.vmem_to_hbm [thread:$0]  %s1092_s21, 256, %s1094_s23, [#allocation4], %s1463_s17, %s1463_s17, %s1464_s18  }
 0x597   :  { %1110 = dma.vmem_to_hbm [thread:$0]  %s1106_s25, 32, %s1108_s27, [#allocation15]  }
 0x598   :  { %1458 = dma.done.wait [#allocation4], 256  }
 0x599   :  { %1459 = vsyncadd [#allocation4], 4294967040 }
 0x59a   :  { %1460 = dma.done.wait [#allocation15], 32  }
 0x59b   :  { %1461 = vsyncadd [#allocation15], 4294967264 }
 0x59c   :  { %1119 = vsyncpa [#allocation3], 1 }
 0x59d   :  { %1120 = vsyncpa [#allocation6], 1 }
 0x59e   :  { %1121 = vsyncpa [#allocation9], 1 }
 0x59f   :  { %1122 = vsyncpa [#allocation12], 1 }
 0x5a0   :  { %1123 = vsyncpa [#allocation4], 1 }
 0x5a1   :  { %1124 = vsyncpa [#allocation15], 1 }

</bundles_post_ra>
